<compile_context>
chip_gen: v6e
topology: v6e:2x2x1
jax: 0.10.0
libtpu: 0.0.40
codegen_flags: <defaults>
</compile_context>

<pallas_src>
import math

import jax
import jax.numpy as jnp
from jax import lax
from jax.experimental import pallas as pl
from jax.experimental.pallas import tpu as pltpu

# ----------------------------- small synthetic config -----------------------
VOCAB = 64
HIDDEN = 32
NUM_HEADS = 2
HEAD_DIM = HIDDEN // NUM_HEADS
FFN = 64
NUM_LAYERS = 2

MAG_SIZE = 12
PRE_SIZE = 12
TOPD_SIZE = 12
LOWD_SIZE = 12
ORDER_SIZE = 8
TREE_DEPTH = 3
NODE_VOCAB = 8
NUM_FORMAT = 11
NUM_CTC_TYPES = 5
CTC_LOGIT_PAD = 128          # pad classifier output to a full lane width
MAX_CELLS = 8
ATTN_DIST_THRESHOLD = 4
NEG_INF = -10000.0


# ----------------------------- in-kernel helpers ----------------------------
def _ln(x, g, b, eps=1e-12):
    mu = jnp.mean(x, axis=-1, keepdims=True)
    var = jnp.mean((x - mu) ** 2, axis=-1, keepdims=True)
    return (x - mu) * lax.rsqrt(var + eps) * g + b


def _gelu(x):
    # TODO(synk): original TUTA gelu uses exact erf; tanh approximation used here
    # for a guaranteed Mosaic lowering.
    return 0.5 * x * (1.0 + jnp.tanh(0.7978845608028654 * (x + 0.044715 * x * x * x)))


def _nbytes(shape, dtype):
    n = 1
    for d in shape:
        n *= int(d)
    return n * jnp.dtype(dtype).itemsize


# ----------------------------- fused encoder stack ---------------------------
def encoder_stack(x_sum, attn_mask, eln, layers, *, batch_block=None):
    """Embedding LayerNorm + NUM_LAYERS transformer layers in ONE pallas_call.

    x_sum     : (B, S, H) f32  summed (pre-LayerNorm) embeddings
    attn_mask : (B, S, S) int8 1 = attendable key, 0 = masked (expanded in-kernel)
    eln       : (2, H)    f32  [gamma; beta] of the embedding LayerNorm
    layers    : dict of per-layer weights stacked on a leading L axis
                (matmul weights in bf16, softmax scale pre-folded into wqkv[...,:H])
    """
    B, S, H = x_sum.shape
    if batch_block is None:
        # Keep >=2 grid steps on the batch axis so v7x megacore can shard it.
        # At production sizes pick the largest BB with M = BB*S a multiple of
        # 256 (v6e/v7x MXU) / 128 (v5e) that still fits VMEM.
        batch_block = B // 2 if (B % 2 == 0 and B >= 2) else B
    BB = batch_block
    assert B % BB == 0
    nB = B // BB
    L = layers["wqkv"].shape[0]
    F = layers["w1"].shape[-1]
    M = BB * S

    def kernel(x_ref, mask_ref, eln_ref,
               wqkv_ref, wo_ref, w1_ref, b1_ref, w2_ref, vecs_ref,
               out_ref):
        layer = pl.program_id(1)

        # Layer 0: load summed embeddings once, apply the embedding LayerNorm,
        # and keep the activation resident in out_ref (its block index is
        # constant over the layer axis, so it lives in VMEM until the batch
        # block changes).
        @pl.when(layer == 0)
        def _():
            out_ref[...] = _ln(x_ref[...].reshape(M, H),
                               eln_ref[0:1, :], eln_ref[1:2, :]).reshape(BB, S, H)

        x2 = out_ref[...].reshape(M, H)                      # (M, H) f32 resident

        vecs = vecs_ref[0]                                   # (9, H) packed f32 vectors
        # rows: 0..2 = bq (pre-scaled), bk, bv ; 3 = bo ; 4,5 = ln1 g,b ;
        #       6 = b2 ; 7,8 = ln2 g,b
        bias = (mask_ref[...].astype(jnp.float32) - 1.0) * (-NEG_INF)   # (BB,S,S)

        # Fused QKV projection on the flattened (BB*S, H) tile (bf16 MXU, f32 acc).
        qkv = jnp.dot(x2.astype(jnp.bfloat16), wqkv_ref[0],
                      preferred_element_type=jnp.float32)               # (M, 3H) f32
        q = (qkv[:, 0:H] + vecs[0:1, :]).astype(jnp.bfloat16).reshape(BB, S, H)
        k = (qkv[:, H:2 * H] + vecs[1:2, :]).astype(jnp.bfloat16).reshape(BB, S, H)
        v = (qkv[:, 2 * H:3 * H] + vecs[2:3, :]).astype(jnp.bfloat16).reshape(BB, S, H)

        # Per-head attention via batched einsums; context assembled with one
        # lane-concat.  The softmax scale is already folded into wqkv / bq.
        ctx_heads = []
        for hidx in range(NUM_HEADS):
            sl = slice(hidx * HEAD_DIM, (hidx + 1) * HEAD_DIM)
            qh, kh, vh = q[:, :, sl], k[:, :, sl], v[:, :, sl]
            s = jnp.einsum("bqd,bkd->bqk", qh, kh,
                           preferred_element_type=jnp.float32) + bias
            s = s - jnp.max(s, axis=-1, keepdims=True)
            p = jnp.exp(s)
            p = p * pl.reciprocal(jnp.sum(p, axis=-1, keepdims=True), approx=True)
            ctx_heads.append(jnp.einsum("bqk,bkd->bqd", p.astype(jnp.bfloat16), vh,
                                        preferred_element_type=jnp.float32))
        ctx = jnp.concatenate(ctx_heads, axis=-1).reshape(M, H)

        attn_out = jnp.dot(ctx.astype(jnp.bfloat16), wo_ref[0],
                           preferred_element_type=jnp.float32) + vecs[3:4, :]
        h1 = _ln(x2 + attn_out, vecs[4:5, :], vecs[5:6, :])

        ff = jnp.dot(h1.astype(jnp.bfloat16), w1_ref[0],
                     preferred_element_type=jnp.float32) + b1_ref[0]
        ff = _gelu(ff)
        ff = jnp.dot(ff.astype(jnp.bfloat16), w2_ref[0],
                     preferred_element_type=jnp.float32) + vecs[6:7, :]
        x_new = _ln(h1 + ff, vecs[7:8, :], vecs[8:9, :])

        out_ref[...] = x_new.reshape(BB, S, H)

    in_specs = [
        pl.BlockSpec((BB, S, H), lambda b, l: (b, 0, 0)),       # x_sum (fetched once per b)
        pl.BlockSpec((BB, S, S), lambda b, l: (b, 0, 0)),       # int8 attn mask
        pl.BlockSpec((2, H), lambda b, l: (0, 0)),              # embed LN gamma/beta
        pl.BlockSpec((1, H, 3 * H), lambda b, l: (l, 0, 0)),    # wqkv (bf16)
        pl.BlockSpec((1, H, H), lambda b, l: (l, 0, 0)),        # wo   (bf16)
        pl.BlockSpec((1, H, F), lambda b, l: (l, 0, 0)),        # w1   (bf16)
        pl.BlockSpec((1, 1, F), lambda b, l: (l, 0, 0)),        # b1   (f32, F lanes)
        pl.BlockSpec((1, F, H), lambda b, l: (l, 0, 0)),        # w2   (bf16)
        pl.BlockSpec((1, 9, H), lambda b, l: (l, 0, 0)),        # packed (.,H) vectors
    ]

    # Explicit scoped-VMEM budget from the actual per-step block bytes
    # (x2 for double buffering, x2 headroom), instead of the 16/32 MiB defaults.
    block_bytes = (
        _nbytes((BB, S, H), jnp.float32) + _nbytes((BB, S, S), jnp.int8)
        + _nbytes((2, H), jnp.float32)
        + _nbytes((1, H, 3 * H), jnp.bfloat16) + _nbytes((1, H, H), jnp.bfloat16)
        + _nbytes((1, H, F), jnp.bfloat16) + _nbytes((1, 1, F), jnp.float32)
        + _nbytes((1, F, H), jnp.bfloat16) + _nbytes((1, 9, H), jnp.float32)
        + _nbytes((BB, S, H), jnp.float32))
    vmem_limit = int(min(96 * 2 ** 20, max(16 * 2 ** 20, 4 * block_bytes)))

    return pl.pallas_call(
        kernel,
        out_shape=jax.ShapeDtypeStruct((B, S, H), jnp.float32),
        grid_spec=pltpu.PrefetchScalarGridSpec(
            num_scalar_prefetch=0,
            grid=(nB, L),
            in_specs=in_specs,
            out_specs=pl.BlockSpec((BB, S, H), lambda b, l: (b, 0, 0))),
        compiler_params=pltpu.CompilerParams(
            dimension_semantics=("parallel", "arbitrary"),
            vmem_limit_bytes=vmem_limit),
    )(x_sum, attn_mask, eln, layers["wqkv"], layers["wo"],
      layers["w1"], layers["b1"], layers["w2"], layers["vecs"])


# ----------------------------- CTC head MLP kernel ----------------------------
def _ctc_head_kernel(x_ref, wu_ref, bu_ref, wp_ref, bp_ref, out_ref):
    h = jnp.tanh(jnp.dot(x_ref[...], wu_ref[...],
                         preferred_element_type=jnp.float32) + bu_ref[...])
    out_ref[...] = (jnp.dot(h, wp_ref[...], preferred_element_type=jnp.float32)
                    + bp_ref[...])


def ctc_head_logits(cell_states_flat, head):
    """cell_states_flat: (N, H) -> (N, NUM_CTC_TYPES) logits.

    One grid-less pallas_call; classifier output is padded to 128 lanes so the
    final store is a full-lane (unmasked) vst, then sliced back in JAX.
    """
    N, H = cell_states_flat.shape
    P = head["wp_pad"].shape[-1]
    logits_pad = pl.pallas_call(
        _ctc_head_kernel,
        out_shape=jax.ShapeDtypeStruct((N, P), jnp.float32),
    )(cell_states_flat, head["wu"], head["bu"], head["wp_pad"], head["bp_pad"])
    return logits_pad[:, :NUM_CTC_TYPES]


# ----------------------------- parameters ------------------------------------
def init_params(key):
    def nrm(k, shape, scale=0.02):
        return scale * jax.random.normal(k, shape, jnp.float32)

    keys = iter(jax.random.split(key, 32))
    L, H, F = NUM_LAYERS, HIDDEN, FFN
    scale = 1.0 / math.sqrt(HEAD_DIM)

    # fused QKV with the softmax scale folded into the Q columns
    wqkv = nrm(next(keys), (L, H, 3 * H))
    wqkv = wqkv.at[:, :, :H].multiply(scale)

    # packed per-layer (.,H) vectors: [bq*scale, bk, bv, bo, ln1_g, ln1_b, b2, ln2_g, ln2_b]
    bqkv = jnp.zeros((L, 3, H), jnp.float32)
    bqkv = bqkv.at[:, 0, :].multiply(scale)
    vecs = jnp.concatenate(
        [bqkv,
         jnp.zeros((L, 1, H)),          # bo
         jnp.ones((L, 1, H)),           # ln1 gamma
         jnp.zeros((L, 1, H)),          # ln1 beta
         jnp.zeros((L, 1, H)),          # b2
         jnp.ones((L, 1, H)),           # ln2 gamma
         jnp.zeros((L, 1, H))],         # ln2 beta
        axis=1).astype(jnp.float32)     # (L, 9, H)

    wp = nrm(next(keys), (H, NUM_CTC_TYPES))
    wp_pad = jnp.zeros((H, CTC_LOGIT_PAD), jnp.float32).at[:, :NUM_CTC_TYPES].set(wp)

    params = {
        "emb": {
            "word": nrm(next(keys), (VOCAB, H)),
            "mag": nrm(next(keys), (MAG_SIZE, H // 4)),
            "pre": nrm(next(keys), (PRE_SIZE, H // 4)),
            "top": nrm(next(keys), (TOPD_SIZE, H // 4)),
            "low": nrm(next(keys), (LOWD_SIZE, H // 4)),
            "order": nrm(next(keys), (ORDER_SIZE, H)),
            "tree_top": nrm(next(keys), (TREE_DEPTH * NODE_VOCAB, H)),
            "tree_left": nrm(next(keys), (TREE_DEPTH * NODE_VOCAB, H)),
            "fmt_w": nrm(next(keys), (NUM_FORMAT, H)),
            "fmt_b": jnp.zeros((H,), jnp.float32),
            # embedding LayerNorm packed as [gamma; beta]
            "eln": jnp.stack([jnp.ones((H,), jnp.float32),
                              jnp.zeros((H,), jnp.float32)], axis=0),   # (2, H)
        },
        # per-layer weights stacked along a leading L axis; matmul weights bf16
        "layers": {
            "wqkv": wqkv.astype(jnp.bfloat16),
            "wo": nrm(next(keys), (L, H, H)).astype(jnp.bfloat16),
            "w1": nrm(next(keys), (L, H, F)).astype(jnp.bfloat16),
            "b1": jnp.zeros((L, 1, F), jnp.float32),
            "w2": nrm(next(keys), (L, F, H)).astype(jnp.bfloat16),
            "vecs": vecs,
        },
        "head": {
            "wu": nrm(next(keys), (H, H)),
            "bu": jnp.zeros((1, H), jnp.float32),
            "wp_pad": wp_pad,
            "bp_pad": jnp.zeros((1, CTC_LOGIT_PAD), jnp.float32),
        },
    }
    return params


# ----------------------------- glue (embeddings / mask / head stats) ---------
def embed_sum(params, token_id, num_mag, num_pre, num_top, num_low,
              token_order, pos_top, pos_left, format_vec):
    """Summed embeddings (pre-LayerNorm); LN is fused into the encoder kernel."""
    e = params["emb"]
    word = e["word"][token_id]                                        # (B,S,H)
    num = jnp.concatenate([e["mag"][num_mag], e["pre"][num_pre],
                           e["top"][num_top], e["low"][num_low]], axis=-1)
    order = e["order"][token_order]
    depth_off = jnp.arange(TREE_DEPTH, dtype=jnp.int32) * NODE_VOCAB
    tree = (e["tree_top"][pos_top + depth_off].sum(axis=-2)
            + e["tree_left"][pos_left + depth_off].sum(axis=-2))
    fmt = format_vec @ e["fmt_w"] + e["fmt_b"]
    return word + num + order + tree + fmt


def build_attn_mask(pos_top, pos_left, indicator):
    """int8 mask: 1 = attendable (close in tree AND key not padding), 0 = masked."""
    dist = ((pos_top[:, :, None, :] != pos_top[:, None, :, :]).sum(-1)
            + (pos_left[:, :, None, :] != pos_left[:, None, :, :]).sum(-1))
    allowed = dist <= ATTN_DIST_THRESHOLD
    key_valid = (indicator != 0)[:, None, :]
    return (allowed & key_valid).astype(jnp.int8)


def _ce_stats(logits, labels):
    valid = labels >= 0
    safe = jnp.where(valid, labels, 0)
    logz = jax.nn.logsumexp(logits, axis=-1)
    nll = logz - jnp.take_along_axis(logits, safe[:, None], axis=-1)[:, 0]
    count = valid.sum().astype(jnp.int32)
    loss = jnp.where(count > 0,
                     (nll * valid).sum() / jnp.maximum(count, 1).astype(jnp.float32),
                     0.0)
    pred = jnp.argmax(logits, axis=-1).astype(labels.dtype)
    correct = ((pred == labels) & valid).sum().astype(jnp.int32)
    return loss, correct, count


def ctc_head(params, encoded, indicator, ctc_label):
    B, S, H = encoded.shape
    C = MAX_CELLS
    cell_ids = jnp.arange(1, C + 1, dtype=jnp.int32)
    sep_sel = (indicator[:, None, :] == (2 * cell_ids - 1)[None, :, None]).astype(jnp.float32)
    tok_sel = (indicator[:, None, :] == (2 * cell_ids)[None, :, None]).astype(jnp.float32)

    sep_states = jnp.einsum("bcs,bsh->bch", sep_sel, encoded)
    tok_cnt = tok_sel.sum(-1, keepdims=True)
    tok_states = jnp.einsum("bcs,bsh->bch", tok_sel, encoded) / jnp.maximum(tok_cnt, 1.0)

    present = sep_sel.sum(-1) > 0
    # integer gather of the cell label from its [SEP] token position
    sep_idx = jnp.argmax(sep_sel, axis=-1).astype(jnp.int32)          # (B, C)
    cell_label = jnp.where(present,
                           jnp.take_along_axis(ctc_label, sep_idx, axis=1),
                           -1)

    stacked = jnp.concatenate([sep_states, tok_states], axis=0)        # (2B,C,H)
    logits = ctc_head_logits(stacked.reshape(2 * B * C, H), params["head"])
    logits = logits.reshape(2 * B, C, NUM_CTC_TYPES)
    sep_logits, tok_logits = logits[:B], logits[B:]

    labels_flat = cell_label.reshape(-1)
    sep_triple = _ce_stats(sep_logits.reshape(-1, NUM_CTC_TYPES), labels_flat)
    tok_triple = _ce_stats(tok_logits.reshape(-1, NUM_CTC_TYPES), labels_flat)
    return sep_triple, tok_triple


@jax.jit
def tuta_for_ctc(params, token_id, num_mag, num_pre, num_top, num_low,
                 token_order, pos_top, pos_left, format_vec, indicator, ctc_label):
    x_sum = embed_sum(params, token_id, num_mag, num_pre, num_top, num_low,
                      token_order, pos_top, pos_left, format_vec)
    mask = build_attn_mask(pos_top, pos_left, indicator)
    encoded = encoder_stack(x_sum, mask, params["emb"]["eln"], params["layers"])
    # NOTE: fully-masked padding query rows receive a uniform softmax (garbage
    # context); they are excluded from CTC pooling so the loss is unaffected.
    return ctc_head(params, encoded, indicator, ctc_label)


# ----------------------------- demo ------------------------------------------
if __name__ == "__main__":
    key = jax.random.PRNGKey(0)
    pkey, dkey = jax.random.split(key)
    params = init_params(pkey)

    B, S = 2, 16
    ks = jax.random.split(dkey, 16)
    token_id = jax.random.randint(ks[0], (B, S), 0, VOCAB, dtype=jnp.int32)
    num_mag = jax.random.randint(ks[1], (B, S), 0, MAG_SIZE, dtype=jnp.int32)
    num_pre = jax.random.randint(ks[2], (B, S), 0, PRE_SIZE, dtype=jnp.int32)
    num_top = jax.random.randint(ks[3], (B, S), 0, TOPD_SIZE, dtype=jnp.int32)
    num_low = jax.random.randint(ks[4], (B, S), 0, LOWD_SIZE, dtype=jnp.int32)
    pos_top = jax.random.randint(ks[5], (B, S, TREE_DEPTH), 0, NODE_VOCAB, dtype=jnp.int32)
    pos_left = jax.random.randint(ks[6], (B, S, TREE_DEPTH), 0, NODE_VOCAB, dtype=jnp.int32)
    format_vec = jax.random.uniform(ks[7], (B, S, NUM_FORMAT), jnp.float32)

    # 5 cells of 3 tokens each ([SEP] tok tok), 1 trailing pad token.
    n_cells, cell_len = 5, 3
    ind_row, order_row = [], []
    for c in range(1, n_cells + 1):
        ind_row += [2 * c - 1] + [2 * c] * (cell_len - 1)
        order_row += list(range(cell_len))
    ind_row += [0] * (S - n_cells * cell_len)
    order_row += [0] * (S - n_cells * cell_len)
    indicator = jnp.tile(jnp.array(ind_row, jnp.int32)[None, :], (B, 1))
    token_order = jnp.tile(jnp.array(order_row, jnp.int32)[None, :], (B, 1))

    cell_types = jax.random.randint(ks[8], (B, n_cells), 0, NUM_CTC_TYPES, dtype=jnp.int32)
    ctc_label = jnp.full((B, S), -1, jnp.int32)
    for c in range(n_cells):
        start = c * cell_len
        ctc_label = ctc_label.at[:, start:start + cell_len].set(cell_types[:, c:c + 1])

    sep_triple, tok_triple = tuta_for_ctc(
        params, token_id, num_mag, num_pre, num_top, num_low,
        token_order, pos_top, pos_left, format_vec, indicator, ctc_label)
    jax.block_until_ready((sep_triple, tok_triple))
    print("KERNEL_OK")
</pallas_src>

<mosaic_0001>
module attributes {stable_mosaic.version = 11 : i64} {
  func.func @kernel(%arg0: i32, %arg1: i32, %arg2: memref<1x16x32xf32, #tpu.memory_space<vmem>>, %arg3: memref<1x16x16xi8, #tpu.memory_space<vmem>>, %arg4: memref<2x32xf32, #tpu.memory_space<vmem>>, %arg5: memref<1x32x96xbf16, #tpu.memory_space<vmem>>, %arg6: memref<1x32x32xbf16, #tpu.memory_space<vmem>>, %arg7: memref<1x32x64xbf16, #tpu.memory_space<vmem>>, %arg8: memref<1x1x64xf32, #tpu.memory_space<vmem>>, %arg9: memref<1x64x32xbf16, #tpu.memory_space<vmem>>, %arg10: memref<1x9x32xf32, #tpu.memory_space<vmem>>, %arg11: memref<1x16x32xf32, #tpu.memory_space<vmem>>) attributes {dimension_semantics = [#tpu.dimension_semantics<parallel>, #tpu.dimension_semantics<arbitrary>], iteration_bounds = array<i64: 2, 2>, scalar_prefetch = 0 : i64, scratch_operands = 0 : i64, tpu.core_type = #tpu.core_type<tc>, window_params = [{transform_indices = @transform_0, window_bounds = array<i64: 1, 16, 32>}, {transform_indices = @transform_1, window_bounds = array<i64: 1, 16, 16>}, {pipeline_mode = #tpu.pipeline_mode<synchronous>, transform_indices = @transform_2, window_bounds = array<i64: 2, 32>}, {transform_indices = @transform_3, window_bounds = array<i64: 1, 32, 96>}, {transform_indices = @transform_4, window_bounds = array<i64: 1, 32, 32>}, {transform_indices = @transform_5, window_bounds = array<i64: 1, 32, 64>}, {transform_indices = @transform_6, window_bounds = array<i64: 1, 1, 64>}, {transform_indices = @transform_7, window_bounds = array<i64: 1, 64, 32>}, {transform_indices = @transform_8, window_bounds = array<i64: 1, 9, 32>}, {transform_indices = @transform_9, window_bounds = array<i64: 1, 16, 32>}]} {
    %c0_i32 = arith.constant 0 : i32
    %0 = arith.cmpi eq, %arg1, %c0_i32 : i32
    %1 = arith.extui %0 : i1 to i32
    %c0_i32_0 = arith.constant 0 : i32
    %2 = arith.cmpi ne, %1, %c0_i32_0 : i32
    scf.if %2 {
      %c0_54 = arith.constant 0 : index
      %c0_55 = arith.constant 0 : index
      %c0_56 = arith.constant 0 : index
      %158 = vector.load %arg2[%c0_54, %c0_55, %c0_56] : memref<1x16x32xf32, #tpu.memory_space<vmem>>, vector<1x16x32xf32>
      %159 = vector.shape_cast %158 : vector<1x16x32xf32> to vector<16x32xf32>
      %c0_57 = arith.constant 0 : index
      %c0_58 = arith.constant 0 : index
      %160 = vector.load %arg4[%c0_57, %c0_58] : memref<2x32xf32, #tpu.memory_space<vmem>>, vector<1x32xf32>
      %c1 = arith.constant 1 : index
      %c0_59 = arith.constant 0 : index
      %161 = vector.load %arg4[%c1, %c0_59] : memref<2x32xf32, #tpu.memory_space<vmem>>, vector<1x32xf32>
      %cst_60 = arith.constant dense<0.000000e+00> : vector<16xf32>
      %162 = vector.multi_reduction <add>, %159, %cst_60 [1] : vector<16x32xf32> to vector<16xf32>
      %163 = vector.shape_cast %162 : vector<16xf32> to vector<16x1xf32>
      %cst_61 = arith.constant 3.200000e+01 : f32
      %164 = vector.broadcast %cst_61 : f32 to vector<16x1xf32>
      %165 = arith.divf %163, %164 : vector<16x1xf32>
      %166 = vector.broadcast %165 : vector<16x1xf32> to vector<16x32xf32>
      %167 = arith.subf %159, %166 : vector<16x32xf32>
      %168 = arith.mulf %167, %167 : vector<16x32xf32>
      %cst_62 = arith.constant dense<0.000000e+00> : vector<16xf32>
      %169 = vector.multi_reduction <add>, %168, %cst_62 [1] : vector<16x32xf32> to vector<16xf32>
      %170 = vector.shape_cast %169 : vector<16xf32> to vector<16x1xf32>
      %cst_63 = arith.constant 3.200000e+01 : f32
      %171 = vector.broadcast %cst_63 : f32 to vector<16x1xf32>
      %172 = arith.divf %170, %171 : vector<16x1xf32>
      %173 = vector.broadcast %165 : vector<16x1xf32> to vector<16x32xf32>
      %174 = arith.subf %159, %173 : vector<16x32xf32>
      %cst_64 = arith.constant 9.99999996E-13 : f32
      %175 = vector.broadcast %cst_64 : f32 to vector<16x1xf32>
      %176 = arith.addf %172, %175 : vector<16x1xf32>
      %177 = math.rsqrt %176 : vector<16x1xf32>
      %178 = vector.broadcast %177 : vector<16x1xf32> to vector<16x32xf32>
      %179 = arith.mulf %174, %178 : vector<16x32xf32>
      %180 = vector.broadcast %160 : vector<1x32xf32> to vector<16x32xf32>
      %181 = arith.mulf %179, %180 : vector<16x32xf32>
      %182 = vector.broadcast %161 : vector<1x32xf32> to vector<16x32xf32>
      %183 = arith.addf %181, %182 : vector<16x32xf32>
      %184 = vector.shape_cast %183 : vector<16x32xf32> to vector<1x16x32xf32>
      %c0_65 = arith.constant 0 : index
      %c0_66 = arith.constant 0 : index
      %c0_67 = arith.constant 0 : index
      %185 = vector.load %arg11[%c0_65, %c0_66, %c0_67] : memref<1x16x32xf32, #tpu.memory_space<vmem>>, vector<1x16x32xf32>
      tpu.vector_store %arg11[%c0_65, %c0_66, %c0_67], %184 {strides = array<i32>} : memref<1x16x32xf32, #tpu.memory_space<vmem>>, vector<1x16x32xf32>,
    } else {
    }
    %c0 = arith.constant 0 : index
    %c0_1 = arith.constant 0 : index
    %c0_2 = arith.constant 0 : index
    %3 = vector.load %arg11[%c0, %c0_1, %c0_2] : memref<1x16x32xf32, #tpu.memory_space<vmem>>, vector<1x16x32xf32>
    %4 = vector.shape_cast %3 : vector<1x16x32xf32> to vector<16x32xf32>
    %c0_3 = arith.constant 0 : index
    %c0_4 = arith.constant 0 : index
    %c0_5 = arith.constant 0 : index
    %5 = vector.load %arg10[%c0_3, %c0_4, %c0_5] : memref<1x9x32xf32, #tpu.memory_space<vmem>>, vector<1x9x32xf32>
    %6 = vector.shape_cast %5 : vector<1x9x32xf32> to vector<9x32xf32>
    %c0_6 = arith.constant 0 : index
    %c0_7 = arith.constant 0 : index
    %c0_8 = arith.constant 0 : index
    %7 = vector.load %arg3[%c0_6, %c0_7, %c0_8] : memref<1x16x16xi8, #tpu.memory_space<vmem>>, vector<1x16x16xi8>
    %8 = arith.sitofp %7 : vector<1x16x16xi8> to vector<1x16x16xf32>
    %cst = arith.constant 1.000000e+00 : f32
    %9 = vector.broadcast %cst : f32 to vector<1x16x16xf32>
    %10 = arith.subf %8, %9 : vector<1x16x16xf32>
    %cst_9 = arith.constant 1.000000e+04 : f32
    %11 = vector.broadcast %cst_9 : f32 to vector<1x16x16xf32>
    %12 = arith.mulf %10, %11 : vector<1x16x16xf32>
    %13 = arith.truncf %4 : vector<16x32xf32> to vector<16x32xbf16>
    %c0_10 = arith.constant 0 : index
    %c0_11 = arith.constant 0 : index
    %c0_12 = arith.constant 0 : index
    %14 = vector.load %arg5[%c0_10, %c0_11, %c0_12] : memref<1x32x96xbf16, #tpu.memory_space<vmem>>, vector<1x32x96xbf16>
    %15 = vector.shape_cast %14 : vector<1x32x96xbf16> to vector<32x96xbf16>
    %cst_13 = arith.constant dense<0.000000e+00> : vector<16x96xf32>
    %16 = tpu.matmul %13, %15, %cst_13 {dimension_numbers = #tpu.dot_dimension_numbers<[1], [0], [0], [1], [0, 0, 1, 1], [], []>} : vector<16x32xbf16>, vector<32x96xbf16>, vector<16x96xf32> -> vector<16x96xf32>
    %17 = vector.extract_strided_slice %16 {offsets = [0, 0], sizes = [16, 32], strides = [1, 1]} : vector<16x96xf32> to vector<16x32xf32>
    %18 = vector.extract_strided_slice %6 {offsets = [0, 0], sizes = [1, 32], strides = [1, 1]} : vector<9x32xf32> to vector<1x32xf32>
    %19 = vector.broadcast %18 : vector<1x32xf32> to vector<16x32xf32>
    %20 = arith.addf %17, %19 : vector<16x32xf32>
    %21 = arith.truncf %20 : vector<16x32xf32> to vector<16x32xbf16>
    %22 = vector.shape_cast %21 : vector<16x32xbf16> to vector<1x16x32xbf16>
    %23 = vector.extract_strided_slice %16 {offsets = [0, 32], sizes = [16, 32], strides = [1, 1]} : vector<16x96xf32> to vector<16x32xf32>
    %24 = vector.extract_strided_slice %6 {offsets = [1, 0], sizes = [1, 32], strides = [1, 1]} : vector<9x32xf32> to vector<1x32xf32>
    %25 = vector.broadcast %24 : vector<1x32xf32> to vector<16x32xf32>
    %26 = arith.addf %23, %25 : vector<16x32xf32>
    %27 = arith.truncf %26 : vector<16x32xf32> to vector<16x32xbf16>
    %28 = vector.shape_cast %27 : vector<16x32xbf16> to vector<1x16x32xbf16>
    %29 = vector.extract_strided_slice %16 {offsets = [0, 64], sizes = [16, 32], strides = [1, 1]} : vector<16x96xf32> to vector<16x32xf32>
    %30 = vector.extract_strided_slice %6 {offsets = [2, 0], sizes = [1, 32], strides = [1, 1]} : vector<9x32xf32> to vector<1x32xf32>
    %31 = vector.broadcast %30 : vector<1x32xf32> to vector<16x32xf32>
    %32 = arith.addf %29, %31 : vector<16x32xf32>
    %33 = arith.truncf %32 : vector<16x32xf32> to vector<16x32xbf16>
    %34 = vector.shape_cast %33 : vector<16x32xbf16> to vector<1x16x32xbf16>
    %35 = vector.extract_strided_slice %22 {offsets = [0, 0, 0], sizes = [1, 16, 16], strides = [1, 1, 1]} : vector<1x16x32xbf16> to vector<1x16x16xbf16>
    %36 = vector.extract_strided_slice %28 {offsets = [0, 0, 0], sizes = [1, 16, 16], strides = [1, 1, 1]} : vector<1x16x32xbf16> to vector<1x16x16xbf16>
    %37 = vector.extract_strided_slice %34 {offsets = [0, 0, 0], sizes = [1, 16, 16], strides = [1, 1, 1]} : vector<1x16x32xbf16> to vector<1x16x16xbf16>
    "tpu.trace_start"() <{level = 10 : i32, message = "bqd,bkd->bqk"}> : () -> ()
    %cst_14 = arith.constant dense<0.000000e+00> : vector<1x16x16xf32>
    %38 = tpu.matmul %35, %36, %cst_14 {dimension_numbers = #tpu.dot_dimension_numbers<[2], [2], [1], [1], [0, 0, 0, 1, 1, 1], [0], [0]>} : vector<1x16x16xbf16>, vector<1x16x16xbf16>, vector<1x16x16xf32> -> vector<1x16x16xf32>
    "tpu.trace_stop"() : () -> ()
    %39 = arith.addf %38, %12 : vector<1x16x16xf32>
    %cst_15 = arith.constant dense<0xFF800000> : vector<1x16xf32>
    %40 = vector.multi_reduction <maximumf>, %39, %cst_15 [2] : vector<1x16x16xf32> to vector<1x16xf32>
    %41 = vector.shape_cast %40 : vector<1x16xf32> to vector<1x16x1xf32>
    %42 = vector.broadcast %41 : vector<1x16x1xf32> to vector<1x16x16xf32>
    %43 = arith.subf %39, %42 : vector<1x16x16xf32>
    %44 = math.exp %43 : vector<1x16x16xf32>
    %cst_16 = arith.constant dense<0.000000e+00> : vector<1x16xf32>
    %45 = vector.multi_reduction <add>, %44, %cst_16 [2] : vector<1x16x16xf32> to vector<1x16xf32>
    %46 = vector.shape_cast %45 : vector<1x16xf32> to vector<1x16x1xf32>
    %47 = tpu.reciprocal %46 {approx = true} : vector<1x16x1xf32> -> vector<1x16x1xf32>
    %48 = vector.broadcast %47 : vector<1x16x1xf32> to vector<1x16x16xf32>
    %49 = arith.mulf %44, %48 : vector<1x16x16xf32>
    %50 = arith.truncf %49 : vector<1x16x16xf32> to vector<1x16x16xbf16>
    "tpu.trace_start"() <{level = 10 : i32, message = "bqk,bkd->bqd"}> : () -> ()
    %cst_17 = arith.constant dense<0.000000e+00> : vector<1x16x16xf32>
    %51 = tpu.matmul %50, %37, %cst_17 {dimension_numbers = #tpu.dot_dimension_numbers<[2], [1], [1], [2], [0, 0, 0, 1, 1, 2], [0], [0]>} : vector<1x16x16xbf16>, vector<1x16x16xbf16>, vector<1x16x16xf32> -> vector<1x16x16xf32>
    "tpu.trace_stop"() : () -> ()
    %52 = vector.extract_strided_slice %22 {offsets = [0, 0, 16], sizes = [1, 16, 16], strides = [1, 1, 1]} : vector<1x16x32xbf16> to vector<1x16x16xbf16>
    %53 = vector.extract_strided_slice %28 {offsets = [0, 0, 16], sizes = [1, 16, 16], strides = [1, 1, 1]} : vector<1x16x32xbf16> to vector<1x16x16xbf16>
    %54 = vector.extract_strided_slice %34 {offsets = [0, 0, 16], sizes = [1, 16, 16], strides = [1, 1, 1]} : vector<1x16x32xbf16> to vector<1x16x16xbf16>
    "tpu.trace_start"() <{level = 10 : i32, message = "bqd,bkd->bqk"}> : () -> ()
    %cst_18 = arith.constant dense<0.000000e+00> : vector<1x16x16xf32>
    %55 = tpu.matmul %52, %53, %cst_18 {dimension_numbers = #tpu.dot_dimension_numbers<[2], [2], [1], [1], [0, 0, 0, 1, 1, 1], [0], [0]>} : vector<1x16x16xbf16>, vector<1x16x16xbf16>, vector<1x16x16xf32> -> vector<1x16x16xf32>
    "tpu.trace_stop"() : () -> ()
    %56 = arith.addf %55, %12 : vector<1x16x16xf32>
    %cst_19 = arith.constant dense<0xFF800000> : vector<1x16xf32>
    %57 = vector.multi_reduction <maximumf>, %56, %cst_19 [2] : vector<1x16x16xf32> to vector<1x16xf32>
    %58 = vector.shape_cast %57 : vector<1x16xf32> to vector<1x16x1xf32>
    %59 = vector.broadcast %58 : vector<1x16x1xf32> to vector<1x16x16xf32>
    %60 = arith.subf %56, %59 : vector<1x16x16xf32>
    %61 = math.exp %60 : vector<1x16x16xf32>
    %cst_20 = arith.constant dense<0.000000e+00> : vector<1x16xf32>
    %62 = vector.multi_reduction <add>, %61, %cst_20 [2] : vector<1x16x16xf32> to vector<1x16xf32>
    %63 = vector.shape_cast %62 : vector<1x16xf32> to vector<1x16x1xf32>
    %64 = tpu.reciprocal %63 {approx = true} : vector<1x16x1xf32> -> vector<1x16x1xf32>
    %65 = vector.broadcast %64 : vector<1x16x1xf32> to vector<1x16x16xf32>
    %66 = arith.mulf %61, %65 : vector<1x16x16xf32>
    %67 = arith.truncf %66 : vector<1x16x16xf32> to vector<1x16x16xbf16>
    "tpu.trace_start"() <{level = 10 : i32, message = "bqk,bkd->bqd"}> : () -> ()
    %cst_21 = arith.constant dense<0.000000e+00> : vector<1x16x16xf32>
    %68 = tpu.matmul %67, %54, %cst_21 {dimension_numbers = #tpu.dot_dimension_numbers<[2], [1], [1], [2], [0, 0, 0, 1, 1, 2], [0], [0]>} : vector<1x16x16xbf16>, vector<1x16x16xbf16>, vector<1x16x16xf32> -> vector<1x16x16xf32>
    "tpu.trace_stop"() : () -> ()
    %69 = tpu.concatenate %51, %68 in 2 : vector<1x16x16xf32>, vector<1x16x16xf32> -> vector<1x16x32xf32>
    %70 = vector.shape_cast %69 : vector<1x16x32xf32> to vector<16x32xf32>
    %71 = arith.truncf %70 : vector<16x32xf32> to vector<16x32xbf16>
    %c0_22 = arith.constant 0 : index
    %c0_23 = arith.constant 0 : index
    %c0_24 = arith.constant 0 : index
    %72 = vector.load %arg6[%c0_22, %c0_23, %c0_24] : memref<1x32x32xbf16, #tpu.memory_space<vmem>>, vector<1x32x32xbf16>
    %73 = vector.shape_cast %72 : vector<1x32x32xbf16> to vector<32x32xbf16>
    %cst_25 = arith.constant dense<0.000000e+00> : vector<16x32xf32>
    %74 = tpu.matmul %71, %73, %cst_25 {dimension_numbers = #tpu.dot_dimension_numbers<[1], [0], [0], [1], [0, 0, 1, 1], [], []>} : vector<16x32xbf16>, vector<32x32xbf16>, vector<16x32xf32> -> vector<16x32xf32>
    %75 = vector.extract_strided_slice %6 {offsets = [3, 0], sizes = [1, 32], strides = [1, 1]} : vector<9x32xf32> to vector<1x32xf32>
    %76 = vector.broadcast %75 : vector<1x32xf32> to vector<16x32xf32>
    %77 = arith.addf %74, %76 : vector<16x32xf32>
    %78 = arith.addf %4, %77 : vector<16x32xf32>
    %79 = vector.extract_strided_slice %6 {offsets = [4, 0], sizes = [1, 32], strides = [1, 1]} : vector<9x32xf32> to vector<1x32xf32>
    %80 = vector.extract_strided_slice %6 {offsets = [5, 0], sizes = [1, 32], strides = [1, 1]} : vector<9x32xf32> to vector<1x32xf32>
    %cst_26 = arith.constant dense<0.000000e+00> : vector<16xf32>
    %81 = vector.multi_reduction <add>, %78, %cst_26 [1] : vector<16x32xf32> to vector<16xf32>
    %82 = vector.shape_cast %81 : vector<16xf32> to vector<16x1xf32>
    %cst_27 = arith.constant 3.200000e+01 : f32
    %83 = vector.broadcast %cst_27 : f32 to vector<16x1xf32>
    %84 = arith.divf %82, %83 : vector<16x1xf32>
    %85 = vector.broadcast %84 : vector<16x1xf32> to vector<16x32xf32>
    %86 = arith.subf %78, %85 : vector<16x32xf32>
    %87 = arith.mulf %86, %86 : vector<16x32xf32>
    %cst_28 = arith.constant dense<0.000000e+00> : vector<16xf32>
    %88 = vector.multi_reduction <add>, %87, %cst_28 [1] : vector<16x32xf32> to vector<16xf32>
    %89 = vector.shape_cast %88 : vector<16xf32> to vector<16x1xf32>
    %cst_29 = arith.constant 3.200000e+01 : f32
    %90 = vector.broadcast %cst_29 : f32 to vector<16x1xf32>
    %91 = arith.divf %89, %90 : vector<16x1xf32>
    %92 = vector.broadcast %84 : vector<16x1xf32> to vector<16x32xf32>
    %93 = arith.subf %78, %92 : vector<16x32xf32>
    %cst_30 = arith.constant 9.99999996E-13 : f32
    %94 = vector.broadcast %cst_30 : f32 to vector<16x1xf32>
    %95 = arith.addf %91, %94 : vector<16x1xf32>
    %96 = math.rsqrt %95 : vector<16x1xf32>
    %97 = vector.broadcast %96 : vector<16x1xf32> to vector<16x32xf32>
    %98 = arith.mulf %93, %97 : vector<16x32xf32>
    %99 = vector.broadcast %79 : vector<1x32xf32> to vector<16x32xf32>
    %100 = arith.mulf %98, %99 : vector<16x32xf32>
    %101 = vector.broadcast %80 : vector<1x32xf32> to vector<16x32xf32>
    %102 = arith.addf %100, %101 : vector<16x32xf32>
    %103 = arith.truncf %102 : vector<16x32xf32> to vector<16x32xbf16>
    %c0_31 = arith.constant 0 : index
    %c0_32 = arith.constant 0 : index
    %c0_33 = arith.constant 0 : index
    %104 = vector.load %arg7[%c0_31, %c0_32, %c0_33] : memref<1x32x64xbf16, #tpu.memory_space<vmem>>, vector<1x32x64xbf16>
    %105 = vector.shape_cast %104 : vector<1x32x64xbf16> to vector<32x64xbf16>
    %cst_34 = arith.constant dense<0.000000e+00> : vector<16x64xf32>
    %106 = tpu.matmul %103, %105, %cst_34 {dimension_numbers = #tpu.dot_dimension_numbers<[1], [0], [0], [1], [0, 0, 1, 1], [], []>} : vector<16x32xbf16>, vector<32x64xbf16>, vector<16x64xf32> -> vector<16x64xf32>
    %c0_35 = arith.constant 0 : index
    %c0_36 = arith.constant 0 : index
    %c0_37 = arith.constant 0 : index
    %107 = vector.load %arg8[%c0_35, %c0_36, %c0_37] : memref<1x1x64xf32, #tpu.memory_space<vmem>>, vector<1x1x64xf32>
    %108 = vector.shape_cast %107 : vector<1x1x64xf32> to vector<1x64xf32>
    %109 = vector.broadcast %108 : vector<1x64xf32> to vector<16x64xf32>
    %110 = arith.addf %106, %109 : vector<16x64xf32>
    %cst_38 = arith.constant 5.000000e-01 : f32
    %111 = vector.broadcast %cst_38 : f32 to vector<16x64xf32>
    %112 = arith.mulf %111, %110 : vector<16x64xf32>
    %cst_39 = arith.constant 4.471500e-02 : f32
    %113 = vector.broadcast %cst_39 : f32 to vector<16x64xf32>
    %114 = arith.mulf %113, %110 : vector<16x64xf32>
    %115 = arith.mulf %114, %110 : vector<16x64xf32>
    %116 = arith.mulf %115, %110 : vector<16x64xf32>
    %117 = arith.addf %110, %116 : vector<16x64xf32>
    %cst_40 = arith.constant 0.797884583 : f32
    %118 = vector.broadcast %cst_40 : f32 to vector<16x64xf32>
    %119 = arith.mulf %118, %117 : vector<16x64xf32>
    %120 = math.tanh %119 : vector<16x64xf32>
    %cst_41 = arith.constant 1.000000e+00 : f32
    %121 = vector.broadcast %cst_41 : f32 to vector<16x64xf32>
    %122 = arith.addf %121, %120 : vector<16x64xf32>
    %123 = arith.mulf %112, %122 : vector<16x64xf32>
    %124 = arith.truncf %123 : vector<16x64xf32> to vector<16x64xbf16>
    %c0_42 = arith.constant 0 : index
    %c0_43 = arith.constant 0 : index
    %c0_44 = arith.constant 0 : index
    %125 = vector.load %arg9[%c0_42, %c0_43, %c0_44] : memref<1x64x32xbf16, #tpu.memory_space<vmem>>, vector<1x64x32xbf16>
    %126 = vector.shape_cast %125 : vector<1x64x32xbf16> to vector<64x32xbf16>
    %cst_45 = arith.constant dense<0.000000e+00> : vector<16x32xf32>
    %127 = tpu.matmul %124, %126, %cst_45 {dimension_numbers = #tpu.dot_dimension_numbers<[1], [0], [0], [1], [0, 0, 1, 1], [], []>} : vector<16x64xbf16>, vector<64x32xbf16>, vector<16x32xf32> -> vector<16x32xf32>
    %128 = vector.extract_strided_slice %6 {offsets = [6, 0], sizes = [1, 32], strides = [1, 1]} : vector<9x32xf32> to vector<1x32xf32>
    %129 = vector.broadcast %128 : vector<1x32xf32> to vector<16x32xf32>
    %130 = arith.addf %127, %129 : vector<16x32xf32>
    %131 = arith.addf %102, %130 : vector<16x32xf32>
    %132 = vector.extract_strided_slice %6 {offsets = [7, 0], sizes = [1, 32], strides = [1, 1]} : vector<9x32xf32> to vector<1x32xf32>
    %133 = vector.extract_strided_slice %6 {offsets = [8, 0], sizes = [1, 32], strides = [1, 1]} : vector<9x32xf32> to vector<1x32xf32>
    %cst_46 = arith.constant dense<0.000000e+00> : vector<16xf32>
    %134 = vector.multi_reduction <add>, %131, %cst_46 [1] : vector<16x32xf32> to vector<16xf32>
    %135 = vector.shape_cast %134 : vector<16xf32> to vector<16x1xf32>
    %cst_47 = arith.constant 3.200000e+01 : f32
    %136 = vector.broadcast %cst_47 : f32 to vector<16x1xf32>
    %137 = arith.divf %135, %136 : vector<16x1xf32>
    %138 = vector.broadcast %137 : vector<16x1xf32> to vector<16x32xf32>
    %139 = arith.subf %131, %138 : vector<16x32xf32>
    %140 = arith.mulf %139, %139 : vector<16x32xf32>
    %cst_48 = arith.constant dense<0.000000e+00> : vector<16xf32>
    %141 = vector.multi_reduction <add>, %140, %cst_48 [1] : vector<16x32xf32> to vector<16xf32>
    %142 = vector.shape_cast %141 : vector<16xf32> to vector<16x1xf32>
    %cst_49 = arith.constant 3.200000e+01 : f32
    %143 = vector.broadcast %cst_49 : f32 to vector<16x1xf32>
    %144 = arith.divf %142, %143 : vector<16x1xf32>
    %145 = vector.broadcast %137 : vector<16x1xf32> to vector<16x32xf32>
    %146 = arith.subf %131, %145 : vector<16x32xf32>
    %cst_50 = arith.constant 9.99999996E-13 : f32
    %147 = vector.broadcast %cst_50 : f32 to vector<16x1xf32>
    %148 = arith.addf %144, %147 : vector<16x1xf32>
    %149 = math.rsqrt %148 : vector<16x1xf32>
    %150 = vector.broadcast %149 : vector<16x1xf32> to vector<16x32xf32>
    %151 = arith.mulf %146, %150 : vector<16x32xf32>
    %152 = vector.broadcast %132 : vector<1x32xf32> to vector<16x32xf32>
    %153 = arith.mulf %151, %152 : vector<16x32xf32>
    %154 = vector.broadcast %133 : vector<1x32xf32> to vector<16x32xf32>
    %155 = arith.addf %153, %154 : vector<16x32xf32>
    %156 = vector.shape_cast %155 : vector<16x32xf32> to vector<1x16x32xf32>
    %c0_51 = arith.constant 0 : index
    %c0_52 = arith.constant 0 : index
    %c0_53 = arith.constant 0 : index
    %157 = vector.load %arg11[%c0_51, %c0_52, %c0_53] : memref<1x16x32xf32, #tpu.memory_space<vmem>>, vector<1x16x32xf32>
    tpu.vector_store %arg11[%c0_51, %c0_52, %c0_53], %156 {strides = array<i32>} : memref<1x16x32xf32, #tpu.memory_space<vmem>>, vector<1x16x32xf32>,
    return
  }
  func.func @transform_0(%arg0: i32, %arg1: i32) -> (i32, i32, i32) {
    %c0_i32 = arith.constant 0 : i32
    %c0_i32_0 = arith.constant 0 : i32
    %c0_i32_1 = arith.constant 0 : i32
    return %arg0, %c0_i32, %c0_i32_0 : i32, i32, i32
  }
  func.func @transform_1(%arg0: i32, %arg1: i32) -> (i32, i32, i32) {
    %c0_i32 = arith.constant 0 : i32
    %c0_i32_0 = arith.constant 0 : i32
    %c0_i32_1 = arith.constant 0 : i32
    return %arg0, %c0_i32, %c0_i32_0 : i32, i32, i32
  }
  func.func @transform_2(%arg0: i32, %arg1: i32) -> (i32, i32) {
    %c0_i32 = arith.constant 0 : i32
    %c0_i32_0 = arith.constant 0 : i32
    %c0_i32_1 = arith.constant 0 : i32
    return %c0_i32, %c0_i32_0 : i32, i32
  }
  func.func @transform_3(%arg0: i32, %arg1: i32) -> (i32, i32, i32) {
    %c0_i32 = arith.constant 0 : i32
    %c0_i32_0 = arith.constant 0 : i32
    %c0_i32_1 = arith.constant 0 : i32
    return %arg1, %c0_i32, %c0_i32_0 : i32, i32, i32
  }
  func.func @transform_4(%arg0: i32, %arg1: i32) -> (i32, i32, i32) {
    %c0_i32 = arith.constant 0 : i32
    %c0_i32_0 = arith.constant 0 : i32
    %c0_i32_1 = arith.constant 0 : i32
    return %arg1, %c0_i32, %c0_i32_0 : i32, i32, i32
  }
  func.func @transform_5(%arg0: i32, %arg1: i32) -> (i32, i32, i32) {
    %c0_i32 = arith.constant 0 : i32
    %c0_i32_0 = arith.constant 0 : i32
    %c0_i32_1 = arith.constant 0 : i32
    return %arg1, %c0_i32, %c0_i32_0 : i32, i32, i32
  }
  func.func @transform_6(%arg0: i32, %arg1: i32) -> (i32, i32, i32) {
    %c0_i32 = arith.constant 0 : i32
    %c0_i32_0 = arith.constant 0 : i32
    %c0_i32_1 = arith.constant 0 : i32
    return %arg1, %c0_i32, %c0_i32_0 : i32, i32, i32
  }
  func.func @transform_7(%arg0: i32, %arg1: i32) -> (i32, i32, i32) {
    %c0_i32 = arith.constant 0 : i32
    %c0_i32_0 = arith.constant 0 : i32
    %c0_i32_1 = arith.constant 0 : i32
    return %arg1, %c0_i32, %c0_i32_0 : i32, i32, i32
  }
  func.func @transform_8(%arg0: i32, %arg1: i32) -> (i32, i32, i32) {
    %c0_i32 = arith.constant 0 : i32
    %c0_i32_0 = arith.constant 0 : i32
    %c0_i32_1 = arith.constant 0 : i32
    return %arg1, %c0_i32, %c0_i32_0 : i32, i32, i32
  }
  func.func @transform_9(%arg0: i32, %arg1: i32) -> (i32, i32, i32) {
    %c0_i32 = arith.constant 0 : i32
    %c0_i32_0 = arith.constant 0 : i32
    %c0_i32_1 = arith.constant 0 : i32
    return %arg0, %c0_i32, %c0_i32_0 : i32, i32, i32
  }
}

module attributes {stable_mosaic.version = 11 : i64} {
  func.func @_ctc_head_kernel(%arg0: memref<32x32xf32, #tpu.memory_space<vmem>>, %arg1: memref<32x32xf32, #tpu.memory_space<vmem>>, %arg2: memref<1x32xf32, #tpu.memory_space<vmem>>, %arg3: memref<32x128xf32, #tpu.memory_space<vmem>>, %arg4: memref<1x128xf32, #tpu.memory_space<vmem>>, %arg5: memref<32x128xf32, #tpu.memory_space<vmem>>) attributes {dimension_semantics = [], scalar_prefetch = 0 : i64, scratch_operands = 0 : i64, tpu.core_type = #tpu.core_type<tc>} {
    %c0 = arith.constant 0 : index
    %c0_0 = arith.constant 0 : index
    %0 = vector.load %arg0[%c0, %c0_0] : memref<32x32xf32, #tpu.memory_space<vmem>>, vector<32x32xf32>
    %c0_1 = arith.constant 0 : index
    %c0_2 = arith.constant 0 : index
    %1 = vector.load %arg1[%c0_1, %c0_2] : memref<32x32xf32, #tpu.memory_space<vmem>>, vector<32x32xf32>
    %cst = arith.constant dense<0.000000e+00> : vector<32x32xf32>
    %2 = tpu.matmul %0, %1, %cst {dimension_numbers = #tpu.dot_dimension_numbers<[1], [0], [0], [1], [0, 0, 1, 1], [], []>} : vector<32x32xf32>, vector<32x32xf32>, vector<32x32xf32> -> vector<32x32xf32>
    %c0_3 = arith.constant 0 : index
    %c0_4 = arith.constant 0 : index
    %3 = vector.load %arg2[%c0_3, %c0_4] : memref<1x32xf32, #tpu.memory_space<vmem>>, vector<1x32xf32>
    %4 = vector.broadcast %3 : vector<1x32xf32> to vector<32x32xf32>
    %5 = arith.addf %2, %4 : vector<32x32xf32>
    %6 = math.tanh %5 : vector<32x32xf32>
    %c0_5 = arith.constant 0 : index
    %c0_6 = arith.constant 0 : index
    %7 = vector.load %arg3[%c0_5, %c0_6] : memref<32x128xf32, #tpu.memory_space<vmem>>, vector<32x128xf32>
    %cst_7 = arith.constant dense<0.000000e+00> : vector<32x128xf32>
    %8 = tpu.matmul %6, %7, %cst_7 {dimension_numbers = #tpu.dot_dimension_numbers<[1], [0], [0], [1], [0, 0, 1, 1], [], []>} : vector<32x32xf32>, vector<32x128xf32>, vector<32x128xf32> -> vector<32x128xf32>
    %c0_8 = arith.constant 0 : index
    %c0_9 = arith.constant 0 : index
    %9 = vector.load %arg4[%c0_8, %c0_9] : memref<1x128xf32, #tpu.memory_space<vmem>>, vector<1x128xf32>
    %10 = vector.broadcast %9 : vector<1x128xf32> to vector<32x128xf32>
    %11 = arith.addf %8, %10 : vector<32x128xf32>
    %c0_10 = arith.constant 0 : index
    %c0_11 = arith.constant 0 : index
    %12 = vector.load %arg5[%c0_10, %c0_11] : memref<32x128xf32, #tpu.memory_space<vmem>>, vector<32x128xf32>
    tpu.vector_store %arg5[%c0_10, %c0_11], %11 {strides = array<i32>} : memref<32x128xf32, #tpu.memory_space<vmem>>, vector<32x128xf32>,
    return
  }
}

</mosaic_0001>

<bundles_post_ra>
// kernel: tuta_for_ctc.3
= control target key start
LH: loop header
LB: loop body
LE: loop exit
PB: predicated region body
PF: predicated region fallthrough
CT: control target
= control target key end

     0   :  { %vm35_vm0 = vcmask 261120   ;;  %s407_s1 = inlined_call_operand.vmem [shape: f32[32,32], index: 1, kind: input, shape index: {}]   ;;  %s408_s0 = inlined_call_operand.vmem [shape: f32[32,32], index: 0, kind: input, shape index: {}]   ;;  %s409_s3 = inlined_call_operand.vmem [shape: f32[32,128], index: 3, kind: input, shape index: {}]   ;;  %s410_s2 = inlined_call_operand.vmem [shape: f32[1,32], index: 2, kind: input, shape index: {}]   ;;  %s411_s4 = inlined_call_operand.vmem [shape: f32[1,128], index: 4, kind: input, shape index: {}]   ;;  %s412_s5 = inlined_call_operand.vmem [shape: f32[32,128], index: 5, kind: output, shape index: {}]  }
   0x1   :  { %v27_v0 = vld [vmem:[%s407_s1 + $0x18] sm:$0xff]  ;;  %v26_v1 = vld [vmem:[%s407_s1 + $0x10] sm:$0xff]  ;;  %v20_v2 = vld [vmem:[%s408_s0] sm:$0xff] }
   0x2   :  { %279 = vmatprep.subr.mxu0 %v27_v0  ;;  %v25_v3 = vld [vmem:[%s407_s1 + $0x8] sm:$0xff]  ;;  %287 = vmatprep.mubr.msk.f32.mxu0 %vm35_vm0, %v20_v2  ;;  %v24_v4 = vld [vmem:[%s407_s1] sm:$0xff]  ;;  %v22_v6 = vld [vmem:[%s408_s0 + $0x10] sm:$0xff] }
   0x3   :  { %280 = vmatpush3.msra.mxu0 %v27_v0  ;;  %v21_v5 = vld [vmem:[%s408_s0 + $0x8] sm:$0xff]  ;;  %v23_v7 = vld [vmem:[%s408_s0 + $0x18] sm:$0xff]  ;;  %v139_v9 = vld [vmem:[%s409_s3 + $0x10] sm:$0xff] }
   0x4   :  { %281 = vmatprep.subr.mxu0 %v26_v1  ;;  %v140_v8 = vld [vmem:[%s409_s3 + $0x18] sm:$0xff]  ;;  %v138_v10 = vld [vmem:[%s409_s3 + $0x8] sm:$0xff]  ;;  %v137_v11 = vld [vmem:[%s409_s3] sm:$0xff] }
   0x5   :  { %282 = vmatpush3.msra.mxu0 %v26_v1  ;;  %293 = vmatprep.subr.mxu1 %v140_v8  ;;  %v253_v12 = vld [vmem:[%s410_s2] ss:$0 sm:$0xff] }
   0x6   :  { %283 = vmatprep.subr.mxu0 %v25_v3  ;;  %294 = vmatpush3.msra.mxu1 %v140_v8  ;;  %v258_v25 = vld [vmem:[%s411_s4] ss:$0 sm:$0xff] }
   0x7   :  { %284 = vmatpush3.msra.mxu0 %v25_v3  ;;  %295 = vmatprep.subr.mxu1 %v139_v9 }
   0x8   :  { %285 = vmatprep.subr.mxu0 %v24_v4  ;;  %296 = vmatpush3.msra.mxu1 %v139_v9 }
   0x9   :  { %286 = vmatpush3.msra.mxu0 %v24_v4  ;;  %297 = vmatprep.subr.mxu1 %v138_v10 }
   0xa   :  { %288 = vmatmul.mubr.msk.f32.vlgmr.msra.gmra.mxu0 %vm35_vm0, %v21_v5  ;;  %298 = vmatpush3.msra.mxu1 %v138_v10 }
   0xb   :  { %290 = vmatprep.mubr.msk.f32.mxu0 %vm35_vm0, %v22_v6  ;;  %299 = vmatprep.subr.mxu1 %v137_v11 }
   0xc   :  { %300 = vmatpush3.msra.mxu1 %v137_v11 }
   0xe   :  { %291 = vmatmul.mubr.msk.f32.gmra.mxu0 %vm35_vm0, %v23_v7 }
  0xca   :  { %v289_v13 = vpop.f32.mrf.mxu0 }
  0xcb   :  { %v120_v14 = vadd.f32 %v289_v13, %v253_v12 }
  0xcc   :  { %v114_v15 = vpop.f32.mrf.mxu0 }
  0xcd   :  { %v115_v16 = vadd.f32 %v253_v12, %v114_v15 }
  0xce   :  { %v292_v17 = vpop.f32.mrf.mxu0 }
  0xcf   :  { %307 = vtanh.f32 %v115_v16  ;;  %v130_v18 = vadd.f32 %v292_v17, %v253_v12 }
  0xd0   :  { %309 = vtanh.f32 %v120_v14  ;;  %v124_v19 = vpop.f32.mrf.mxu0 }
  0xd1   :  { %v125_v20 = vadd.f32 %v253_v12, %v124_v19 }
  0xd3   :  { %311 = vtanh.f32 %v125_v20 }
  0xd4   :  { %313 = vtanh.f32 %v130_v18 }
  0xdc   :  { %v308_v21 = vpop.eup %307 }
  0xdd   :  { %v310_v22 = vpop.eup %309  ;;  %301 = vmatprep.mubr.msk.f32.mxu1 %vm35_vm0, %v308_v21 }
  0xde   :  { %302 = vmatmul.mubr.msk.f32.vlgmr.msra.gmra.mxu1 %vm35_vm0, %v310_v22 }
  0xe0   :  { %v312_v23 = vpop.eup %311 }
  0xe1   :  { %v314_v24 = vpop.eup %313  ;;  %304 = vmatprep.mubr.msk.f32.mxu1 %vm35_vm0, %v312_v23 }
  0xe2   :  { %305 = vmatmul.mubr.msk.f32.gmra.mxu1 %vm35_vm0, %v314_v24 }
 0x19e   :  { %v303_v26 = vpop.f32.mrf.mxu1 }
 0x19f   :  { %v232_v27 = vadd.f32 %v303_v26, %v258_v25 }
 0x1a0   :  { %v226_v28 = vpop.f32.mrf.mxu1 }
 0x1a1   :  { %246 = vst [vmem:[%s412_s5 + $0x8] sm:$0xff] %v232_v27  ;;  %v227_v29 = vadd.f32 %v258_v25, %v226_v28 }
 0x1a2   :  { %v306_v30 = vpop.f32.mrf.mxu1 }
 0x1a3   :  { %245 = vst [vmem:[%s412_s5] sm:$0xff] %v227_v29  ;;  %v242_v31 = vadd.f32 %v306_v30, %v258_v25 }
 0x1a4   :  { %v236_v32 = vpop.f32.mrf.mxu1 }
 0x1a5   :  { %248 = vst [vmem:[%s412_s5 + $0x18] sm:$0xff] %v242_v31  ;;  %v237_v33 = vadd.f32 %v258_v25, %v236_v32 }
 0x1a7   :  { %247 = vst [vmem:[%s412_s5 + $0x10] sm:$0xff] %v237_v33 }

// kernel: tuta_for_ctc.2
= control target key start
LH: loop header
LB: loop body
LE: loop exit
PB: predicated region body
PF: predicated region fallthrough
CT: control target
= control target key end

     0   :  { %s1689_s30 = smov 0   ;;  %s1691_s10 = smov 0   ;;  %s1918_s0 = inlined_call_operand.vmem [shape: f32[2,16,32], index: 0, kind: input, shape index: {}]   ;;  %s1919_s1 = inlined_call_operand.vmem [shape: s8[2,16,16], index: 1, kind: input, shape index: {}]   ;;  %s1920_s2 = inlined_call_operand.vmem [shape: f32[2,32], index: 2, kind: input, shape index: {}]   ;;  %s1921_s3 = inlined_call_operand.vmem [shape: bf16[2,32,96], index: 3, kind: input, shape index: {}]   ;;  %s1922_s4 = inlined_call_operand.vmem [shape: bf16[2,32,32], index: 4, kind: input, shape index: {}]   ;;  %s1923_s5 = inlined_call_operand.vmem [shape: bf16[2,32,64], index: 5, kind: input, shape index: {}]   ;;  %s1924_s6 = inlined_call_operand.vmem [shape: f32[2,1,64], index: 6, kind: input, shape index: {}]   ;;  %s1925_s7 = inlined_call_operand.vmem [shape: bf16[2,64,32], index: 7, kind: input, shape index: {}]   ;;  %s1926_s8 = inlined_call_operand.vmem [shape: f32[2,9,32], index: 8, kind: input, shape index: {}]   ;;  %s1927_s9 = inlined_call_operand.vmem [shape: f32[2,16,32], index: 9, kind: output, shape index: {}]  }
   0x1   :  { %1929 = sst [smem:[#allocation5_spill]] %s1918_s0  ;;  %s1693_s11 = smov 0  }
   0x2   :  { %1930 = sst [smem:[#allocation6_spill]] %s1919_s1  ;;  %s1695_s12 = smov 0  }
   0x3   :  { %s1697_s13 = smov 0  }
   0x4 LB: > { %1931 = sst [smem:[#allocation2_spill]] %s1624_s12  ;;  %s28_s14 = sadd.s32 1, %s1620_s11  ;;  %s1628_s13 = sphi %s1697_s13, %s19_s13   ;;  %s1624_s12 = sphi %s1695_s12, %s1939_s12   ;;  %s1620_s11 = sphi %s1693_s11, %s1941_s11   ;;  %s1616_s10 = sphi %s1691_s10, %s1937_s10   ;;  %s1612_s30 = sphi %s1689_s30, %s1940_s30  }
   0x5   : > { %s31_s15 = sadd.s32 1, %s1624_s12  ;;  %p29_p0 = scmp.ge.s32.totalorder %s28_s14, 2 }
   0x6   : > { %p1356_p1 = scmp.ge.s32.totalorder %s1628_s13, 1  ;;  %p367_p2 = scmp.lt.s32.totalorder %s1628_s13, 5 }
   0x7   : > { %s1943_s14 = smov (%p29_p0, %s28_s14), 0  ;;  %s1945_s15 = smov (!%p29_p0, %s31_s15), %s1624_s12 }
   0x8   : > { %1932 = sst [smem:[#allocation3_spill]] %s1943_s14  ;;  %p368_p3 = pnand %p1356_p1, %p367_p2 }
   0x9   : > { %p33_p4 = scmp.ge.s32.totalorder %s1945_s15, 2  ;;  %p436_p5 = scmp.lt.s32.totalorder (!%p368_p3), %s1616_s10, 1 }
   0xa   : > { %371 = sbr.rel (%p368_p3) target bundleno = 2765 (0xacd), region = 56  ;;  %p446_p6 = scmp.lt.s32.totalorder (!%p368_p3), %s1612_s30, 1 }
   0xb   : > { %s1947_s15 = smov (%p33_p4, %s1945_s15), 0  ;;  %s1934_s0 = sld [smem:[#allocation5_spill]] (!%p368_p3) }
   0xc   : > { %1933 = sst [smem:[#allocation4_spill]] %s1947_s15  ;;  %p1373_p7 = scmp.ne.s32.totalorder (!%p368_p3), %s1612_s30, 0 }
   0xd   : > { %s1935_s1 = sld [smem:[#allocation6_spill]] (!%p368_p3) }
   0xf   : > { %s1949_s10 = smov (!%p436_p5, %s1616_s10), 1 }
  0x10   : > { %s1723_s16 = scalar_select %p446_p6, %s1612_s30, 1 }
  0x11   : > { %s1400_s17 = sshll.u32 %s1949_s10, 4  ;;  %s1401_s18 = sshll.u32 %s1949_s10, 2 }
  0x12   : > { %s440_s21 = scalar_lea.vmem %s1934_s0, %s1400_s17  ;;  %s1402_s25 = sshll.u32 %s1723_s16, 4 }
  0x13   : > { %s1731_s24 = scalar_lea.vmem %s1935_s1, %s1401_s18  ;;  %s1741_s14 = scalar_lea.vmem %s1921_s3, %s1402_s25 }
  0x14   : > { %s1746_s19 = scalar_lea.vmem %s1922_s4, %s1402_s25  ;;  %s1751_s18 = scalar_lea.vmem %s1923_s5, %s1402_s25 }
  0x15   : > { %s1405_s22 = sshll.u32 %s1723_s16, 5  ;;  %s1762_s29 = scalar_lea.vmem %s1926_s8, %s1402_s25 }
  0x16   : > { %s1757_s26 = scalar_lea.vmem %s1925_s7, %s1405_s22  ;;  %s1767_s10 = scalar_lea.vmem %s1927_s9, %s1400_s17 }
  0x17   : > { %483 = sbr.rel (%p1373_p7) target bundleno = 342 (0x156), region = 60 }
  0x1c   : > { %v484_v0 = vld [vmem:[%s440_s21] sm:$0xff]  ;;  %vm488_vm0 = vcmask 261120   ;;  %v485_v1 = vld [vmem:[%s440_s21 + $0x8] sm:$0xff] }
  0x1d   : > { %v489_v2 = vsel %vm488_vm0, %v484_v0, 0.0  ;;  %v492_v3 = vsel %vm488_vm0, %v485_v1, 0.0  ;;  %v1374_v21 = vld [vmem:[%s1920_s2] ss:$0 sm:$0xff]  ;;  %v1375_v23 = vld [vmem:[%s1920_s2 + $0x1] ss:$0 sm:$0xff] }
  0x1e   : > { %490 = vadd.xlane.f32.xlu0 %v489_v2 }
  0x22   : > { %493 = vadd.xlane.f32.xlu0 %v492_v3 }
  0xa7   : > { %v491_v4 = vpop.xlane.xlu0 %490 }
  0xa8   : > { %v496_v5 = vmul.f32 0.03125, %v491_v4 }
  0xaa   : > { %v498_v6 = vsub.f32 %v484_v0, %v496_v5 }
  0xab   : > { %v494_v7 = vpop.xlane.xlu0 %493 }
  0xac   : > { %v497_v8 = vmul.f32 0.03125, %v494_v7  ;;  %v500_v9 = vmul.f32 %v498_v6, %v498_v6 }
  0xae   : > { %v499_v10 = vsub.f32 %v485_v1, %v497_v8  ;;  %v502_v11 = vsel %vm488_vm0, %v500_v9, 0.0 }
  0xaf   : > { %503 = vadd.xlane.f32.xlu1 %v502_v11 }
  0xb0   : > { %v501_v12 = vmul.f32 %v499_v10, %v499_v10 }
  0xb2   : > { %v505_v13 = vsel %vm488_vm0, %v501_v12, 0.0 }
  0xb3   : > { %506 = vadd.xlane.f32.xlu1 %v505_v13 }
 0x138   : > { %v504_v14 = vpop.xlane.xlu1 %503 }
 0x139   : > { %v508_v15 = vmul.f32 0.03125, %v504_v14 }
 0x13b   : > { %v510_v16 = vadd.f32 1e-12, %v508_v15 }
 0x13c   : > { %v507_v17 = vpop.xlane.xlu1 %506 }
 0x13d   : > { %1543 = vrsqrt.f32 %v510_v16  ;;  %v509_v18 = vmul.f32 0.03125, %v507_v17 }
 0x13f   : > { %v511_v19 = vadd.f32 1e-12, %v509_v18 }
 0x141   : > { %1545 = vrsqrt.f32 %v511_v19 }
 0x14a   : > { %v1544_v20 = vpop.eup %1543 }
 0x14b   : > { %v514_v22 = vmul.f32 %v1544_v20, %v498_v6 }
 0x14d   : > { %v520_v24 = vmul.f32 %v1374_v21, %v514_v22 }
 0x14e   : > { %v1546_v25 = vpop.eup %1545 }
 0x14f   : > { %v526_v26 = vadd.f32 %v1375_v23, %v520_v24  ;;  %v515_v27 = vmul.f32 %v1546_v25, %v499_v10 }
 0x151   : > { %528 = vst.msk [vmem:[%s1767_s10] sm:$0xff] %vm488_vm0, %v526_v26  ;;  %v521_v28 = vmul.f32 %v1374_v21, %v515_v27 }
 0x153   : > { %v527_v29 = vadd.f32 %v1375_v23, %v521_v28 }
 0x155   : > { %529 = vst.msk [vmem:[%s1767_s10 + $0x8] sm:$0xff] %vm488_vm0, %v527_v29 }
 0x156 PF: > { %v1552_v30 = vld [vmem:[%s1741_s14 + $0x8] sm:$0xff]   ;;  %v606_v31 = vlaneseq  ;;  %v1630_v32 = vmov 0.0   ;;  %v1553_v33 = vld [vmem:[%s1741_s14] sm:$0xff]   ;;  %vm1631_vm1 = vmmov 0   ;;  %vm561_vm2 = vcmask 261120   ;;  %s1632_s14 = smov 32   ;;  %s1936_s23 = scalar_lea.vmem %s1924_s6, %s1723_s16 }
 0x157   : > { %1434 = vmatprep.subr.bf16.mxu0 %v1630_v32  ;;  %1442 = vmatprep.subr.bf16.mxu1 %v1630_v32  ;;  %v1797_v36 = vld [vmem:[%s1762_s29] sm:$0xff]  ;;  %s1633_s21 = smov 80   ;;  %s1634_s25 = smov 96   ;;  %vm638_vm3 = vcmask 130048   ;;  %vm1118_vm4 = vcmask 523264  }
 0x158   : > { %1435 = vmatpush3.bf16.msra.mxu0 %v1552_v30  ;;  %1438 = vmatprep.mubr.msk.bf16.mxu0 %vm1631_vm1, %v1630_v32  ;;  %v1791_v34 = vld [vmem:[%s1767_s10] sm:$0xff]  ;;  %v1799_v37 = vshrl.u32 %v606_v31, 7  ;;  %s1635_s28 = smov 112   ;;  %s1637_s20 = smov 48  }
 0x159   : > { %1436 = vmatprep.subr.bf16.mxu0 %v1630_v32  ;;  %1444 = vmatprep.mubr.msk.bf16.mxu1 %vm1631_vm1, %v1630_v32  ;;  %v1409_v59 = vld [vmem:[%s1731_s24] sm:$0xf]   ;;  %s1636_s24 = smov 64   ;;  %s1638_s22 = smov 16  }
 0x15a   : > { %v615_v38 = vsub.s32 1, %v1799_v37  ;;  %v608_v42 = vsub.s32 0, %v1799_v37  ;;  %v1410_v60 = vunpack.c.0.s8 %v1409_v59  ;;  %v1411_v62 = vunpack.c.1.s8 %v1409_v59 }
 0x15b   : > { %v626_v20 = vsub.s32 2, %v1799_v37 }
 0x15c   : > { %v1794_v35 = vld [vmem:[%s1767_s10 + $0x8] sm:$0xff]  ;;  %1437 = vmatpush3.bf16.msra.mxu0 %v1553_v33  ;;  %v616_v40 = vrot.slane %v1797_v36, %v615_v38  ;;  %v609_v46 = vrot.slane %v1797_v36, %v608_v42  ;;  %v538_v61 = vcvt.s32.f32 %v1410_v60  ;;  %v539_v0 = vcvt.s32.f32 %v1411_v62 }
 0x15d   : > { %v544_v39 = vpack.c.bf16 %v1794_v35, %v1791_v34  ;;  %1448 = vmatprep.subr.bf16.mxu0 %v1630_v32  ;;  %v627_v21 = vrot.slane %v1797_v36, %v626_v20  ;;  %v896_v20 = vsub.s32 3, %v1799_v37 }
 0x15e   : > { %618 = vrot.lane.b32.xlu0 %v616_v40, %s1632_s14  ;;  %v1376_v63 = vadd.f32 -1.0, %v538_v61  ;;  %v1377_v2 = vadd.f32 -1.0, %v539_v0 }
 0x15f   : > { %1439 = vmatmul.mubr.msk.bf16.vlgmr.msra.gmra.mxu0 %vm561_vm2, %v544_v39 }
 0x160   : > { %1450 = vmatprep.mubr.msk.bf16.mxu0 %vm1631_vm1, %v1630_v32  ;;  %v542_v1 = vmul.f32 10000.0, %v1376_v63  ;;  %v543_v5 = vmul.f32 10000.0, %v1377_v2 }
 0x1d0   : > { %v619_v43 = vpop.permute.xlu0 %618 }
 0x21f   : > { %v1812_v41 = vpop.f32.mrf.mxu0 }
 0x220   : > { %v621_v47 = vadd.f32 %v619_v43, %v1812_v41  ;;  %v610_v52 = vadd.f32 %v609_v46, %v1812_v41 }
 0x221   : > { %v1440_v44 = vpop.f32.mrf.mxu0 }
 0x223   : > { %v1815_v45 = vpop.f32.mrf.mxu0 }
 0x224   : > { %v622_v48 = vadd.f32 %v619_v43, %v1815_v45  ;;  %v611_v50 = vadd.f32 %v609_v46, %v1815_v45 }
 0x225   : > { %v1441_v49 = vpop.f32.mrf.mxu0 }
 0x226   : > { %v623_v51 = vpack.c.bf16 %v622_v48, %v621_v47  ;;  %v612_v53 = vpack.c.bf16 %v611_v50, %v610_v52 }
 0x228   : > { %760 = vrot.lane.b32.xlu1 %v623_v51, %s1633_s21  ;;  %636 = vrot.lane.b32.xlu0 %v623_v51, %s1634_s25 }
 0x22c   : > { %758 = vrot.lane.b32.xlu1 %v612_v53, %s1635_s28 }
 0x29a   : > { %v637_v54 = vpop.permute.xlu0 %636  ;;  %v761_v56 = vpop.permute.xlu1 %760 }
 0x29b   : > { %v643_v55 = vsel %vm638_vm3, %v637_v54, 0  ;;  %v766_v57 = vsel %vm638_vm3, %v761_v56, 0 }
 0x29c   : > { %1443 = vmatpush3.bf16.xpose.msra.mxu1 %v643_v55 }
 0x29d   : > { %1454 = vmatprep.subr.bf16.mxu1 %v1630_v32 }
 0x29e   : > { %v759_v58 = vpop.permute.xlu1 %758 }
 0x2a3   : > { %1445 = vmatmul.mubr.msk.bf16.vlgmr.msra.gmra.mxu1 %vm638_vm3, %v612_v53 }
 0x2a4   : > { %1455 = vmatpush3.bf16.xpose.msra.mxu1 %v766_v57  ;;  %1456 = vmatprep.mubr.msk.bf16.mxu1 %vm1631_vm1, %v1630_v32 }
 0x2a5   : > { %1466 = vmatprep.subr.bf16.mxu1 %v1630_v32 }
 0x2ab   : > { %1457 = vmatmul.mubr.msk.bf16.vlgmr.msra.gmra.mxu1 %vm638_vm3, %v759_v58 }
 0x2ac   : > { %1470 = vmatprep.mubr.msk.bf16.mxu1 %vm1631_vm1, %v1630_v32 }
 0x363   : > { %v679_v3 = vpop.f32.mrf.mxu1 }
 0x364   : > { %v680_v4 = vadd.f32 %v679_v3, %v542_v1  ;;  %v1554_v3 = vld [vmem:[%s1746_s19 + $0x8] sm:$0xff]  }
 0x365   : > { %v1446_v6 = vpop.f32.mrf.mxu1  ;;  %1467 = vmatpush3.bf16.msra.mxu1 %v1554_v3  ;;  %v1559_v3 = vld [vmem:[%s1757_s26 + $0x10] sm:$0xff]  }
 0x366   : > { %v686_v7 = vsel %vm638_vm3, %v680_v4, -inf  ;;  %1468 = vmatprep.subr.bf16.mxu1 %v1630_v32  ;;  %v1555_v6 = vld [vmem:[%s1746_s19] sm:$0xff]  }
 0x367   : > { %687 = vmax.xlane.f32.xlu0 %v686_v7  ;;  %v682_v8 = vpop.f32.mrf.mxu1 }
 0x368   : > { %v683_v9 = vadd.f32 %v682_v8, %v543_v5 }
 0x369   : > { %v1447_v10 = vpop.f32.mrf.mxu1  ;;  %1469 = vmatpush3.bf16.msra.mxu1 %v1555_v6  ;;  %v1388_v6 = vld [vmem:[%s1936_s23] ss:$0 sm:$0xff] }
 0x36a   : > { %v689_v11 = vsel %vm638_vm3, %v683_v9, -inf  ;;  %1482 = vmatprep.subr.bf16.mxu1 %v1630_v32 }
 0x36b   : > { %690 = vmax.xlane.f32.xlu1 %v689_v11  ;;  %v802_v12 = vpop.f32.mrf.mxu1 }
 0x36c   : > { %v803_v13 = vadd.f32 %v802_v12, %v542_v1 }
 0x36d   : > { %v1458_v14 = vpop.f32.mrf.mxu1 }
 0x36e   : > { %v809_v15 = vsel %vm638_vm3, %v803_v13, -inf }
 0x36f   : > { %810 = vmax.xlane.f32.xlu0 %v809_v15  ;;  %v805_v16 = vpop.f32.mrf.mxu1 }
 0x370   : > { %v806_v17 = vadd.f32 %v805_v16, %v543_v5 }
 0x371   : > { %v1459_v18 = vpop.f32.mrf.mxu1 }
 0x372   : > { %v812_v19 = vsel %vm638_vm3, %v806_v17, -inf }
 0x373   : > { %813 = vmax.xlane.f32.xlu0 %v812_v19 }
 0x37c   : > { %629 = vrot.lane.b32.xlu1 %v627_v21, %s1636_s24  ;;  %v897_v21 = vrot.slane %v1797_v36, %v896_v20 }
 0x3f0   : > { %v688_v22 = vpop.xlane.xlu0 %687 }
 0x3f1   : > { %v692_v23 = vsub.f32 %v680_v4, %v688_v22 }
 0x3f3   : > { %v694_v24 = vmul.f32 1.442695, %v692_v23 }
 0x3f4   : > { %v691_v25 = vpop.xlane.xlu1 %690 }
 0x3f5   : > { %1562 = vpow2.f32 %v694_v24  ;;  %v693_v26 = vsub.f32 %v683_v9, %v691_v25 }
 0x3f7   : > { %v696_v27 = vmul.f32 1.442695, %v693_v26 }
 0x3f8   : > { %v630_v28 = vpop.permute.xlu1 %629  ;;  %v811_v29 = vpop.xlane.xlu0 %810 }
 0x3f9   : > { %1564 = vpow2.f32 %v696_v27  ;;  %v632_v30 = vadd.f32 %v630_v28, %v1812_v41  ;;  %v633_v31 = vadd.f32 %v630_v28, %v1815_v45  ;;  %v815_v33 = vsub.f32 %v803_v13, %v811_v29 }
 0x3fb   : > { %v634_v38 = vpack.c.bf16 %v633_v31, %v632_v30  ;;  %v817_v39 = vmul.f32 1.442695, %v815_v33 }
 0x3fc   : > { %v814_v40 = vpop.xlane.xlu0 %813 }
 0x3fd   : > { %1566 = vpow2.f32 %v817_v39  ;;  %v816_v42 = vsub.f32 %v806_v17, %v814_v40  ;;  %710 = vrot.lane.b32.xlu1 %v634_v38, %s1636_s24 }
 0x3ff   : > { %v819_v43 = vmul.f32 1.442695, %v816_v42 }
 0x401   : > { %1568 = vpow2.f32 %v819_v43 }
 0x402   : > { %v1563_v44 = vpop.eup %1562 }
 0x403   : > { %v698_v46 = vsel %vm638_vm3, %v1563_v44, 0.0 }
 0x404   : > { %699 = vadd.xlane.f32.xlu0 %v698_v46 }
 0x406   : > { %v1565_v47 = vpop.eup %1564 }
 0x407   : > { %v701_v48 = vsel %vm638_vm3, %v1565_v47, 0.0 }
 0x408   : > { %702 = vadd.xlane.f32.xlu0 %v701_v48  ;;  %v1556_v48 = vld [vmem:[%s1751_s18 + $0x8] sm:$0xff]  }
 0x40a   : > { %v1567_v41 = vpop.eup %1566 }
 0x40b   : > { %v821_v45 = vsel %vm638_vm3, %v1567_v41, 0.0 }
 0x40c   : > { %822 = vadd.xlane.f32.xlu0 %v821_v45 }
 0x40e   : > { %v1569_v49 = vpop.eup %1568 }
 0x40f   : > { %v824_v50 = vsel %vm638_vm3, %v1569_v49, 0.0 }
 0x410   : > { %825 = vadd.xlane.f32.xlu0 %v824_v50 }
 0x426   : > { %832 = vrot.lane.b32.xlu0 %v634_v38, %s1637_s20 }
 0x46f   : > { %v711_v51 = vpop.permute.xlu1 %710 }
 0x470   : > { %1449 = vmatpush3.bf16.msra.mxu0 %v711_v51 }
 0x471   : > { %1460 = vmatprep.subr.bf16.mxu0 %v1630_v32 }
 0x48d   : > { %v700_v52 = vpop.xlane.xlu0 %699 }
 0x48e   : > { %1570 = vrcp.f32 %v700_v52 }
 0x491   : > { %v703_v53 = vpop.xlane.xlu0 %702 }
 0x492   : > { %1572 = vrcp.f32 %v703_v53  ;;  %v985_v53 = vsub.s32 4, %v1799_v37 }
 0x495   : > { %v823_v54 = vpop.xlane.xlu0 %822 }
 0x496   : > { %1574 = vrcp.f32 %v823_v54 }
 0x499   : > { %v826_v55 = vpop.xlane.xlu0 %825 }
 0x49a   : > { %1576 = vrcp.f32 %v826_v55 }
 0x49b   : > { %v1571_v56 = vpop.eup %1570 }
 0x49c   : > { %v706_v58 = vmul.f32 %v1571_v56, %v1563_v44  ;;  %v986_v56 = vrot.slane %v1797_v36, %v985_v53 }
 0x49d   : > { %v833_v61 = vpop.permute.xlu0 %832 }
 0x49f   : > { %v1573_v57 = vpop.eup %1572 }
 0x4a0   : > { %v707_v59 = vmul.f32 %v1573_v57, %v1565_v47  ;;  %v991_v57 = vsub.s32 5, %v1799_v37 }
 0x4a2   : > { %v708_v60 = vpack.c.bf16 %v707_v59, %v706_v58 }
 0x4a3   : > { %v1575_v62 = vpop.eup %1574 }
 0x4a4   : > { %1451 = vmatmul.mubr.msk.bf16.vlgmr.msra.gmra.mxu0 %vm638_vm3, %v708_v60  ;;  %v829_v0 = vmul.f32 %v1575_v62, %v1567_v41 }
 0x4a5   : > { %1461 = vmatpush3.bf16.msra.mxu0 %v833_v61  ;;  %1462 = vmatprep.mubr.msk.bf16.mxu0 %vm1631_vm1, %v1630_v32  ;;  %v992_v61 = vrot.slane %v1797_v36, %v991_v57 }
 0x4a6   : > { %1474 = vmatprep.subr.bf16.mxu0 %v1630_v32 }
 0x4a7   : > { %v1577_v63 = vpop.eup %1576 }
 0x4a8   : > { %v830_v1 = vmul.f32 %v1577_v63, %v1569_v49 }
 0x4aa   : > { %v831_v2 = vpack.c.bf16 %v830_v1, %v829_v0 }
 0x4ac   : > { %1463 = vmatmul.mubr.msk.bf16.vlgmr.msra.gmra.mxu0 %vm638_vm3, %v831_v2  ;;  %v1558_v2 = vld [vmem:[%s1757_s26 + $0x18] sm:$0xff]  }
 0x4ad   : > { %1478 = vmatprep.mubr.msk.bf16.mxu0 %vm1631_vm1, %v1630_v32  ;;  %1475 = vmatpush3.bf16.msra.mxu0 %v1556_v48 }
 0x4ae   : > { %1476 = vmatprep.subr.bf16.mxu0 %v1630_v32 }
 0x564   : > { %v750_v4 = vpop.f32.mrf.mxu0 }
 0x566   : > { %v1452_v5 = vpop.f32.mrf.mxu0 }
 0x567   : > { %v1561_v5 = vld [vmem:[%s1757_s26] sm:$0xff]  }
 0x568   : > { %v753_v7 = vpop.f32.mrf.mxu0 }
 0x56a   : > { %v1453_v8 = vpop.f32.mrf.mxu0 }
 0x56c   : > { %v872_v9 = vpop.f32.mrf.mxu0 }
 0x56e   : > { %v1464_v10 = vpop.f32.mrf.mxu0 }
 0x570   : > { %v875_v11 = vpop.f32.mrf.mxu0 }
 0x571   : > { %v1547_v12 = vpack.i.bf16 %v875_v11, %v872_v9 }
 0x572   : > { %v1465_v13 = vpop.f32.mrf.mxu0 }
 0x573   : > { %1548 = vrot.lane.b32.xlu1 %v1547_v12, %s1638_s22 }
 0x5e5   : > { %v1549_v14 = vpop.permute.xlu1 %1548 }
 0x5e6   : > { %v1551_v15 = vunpack.i.h.bf16 %v1549_v14  ;;  %v1550_v16 = vunpack.i.l.bf16 %v1549_v14 }
 0x5e8   : > { %v888_v17 = vsel %vm638_vm3, %v753_v7, %v1551_v15  ;;  %v887_v18 = vsel %vm638_vm3, %v750_v4, %v1550_v16  ;;  %v1560_v4 = vld [vmem:[%s1757_s26 + $0x8] sm:$0xff]  }
 0x5e9   : > { %v889_v19 = vpack.c.bf16 %v888_v17, %v887_v18 }
 0x5eb   : > { %1471 = vmatmul.mubr.msk.bf16.vlgmr.msra.gmra.mxu1 %vm561_vm2, %v889_v19 }
 0x5ec   : > { %1490 = vmatprep.mubr.msk.bf16.mxu1 %vm1631_vm1, %v1630_v32  ;;  %1483 = vmatpush3.bf16.msra.mxu1 %v1558_v2  ;;  %v1397_v2 = vld [vmem:[%s1762_s29 + $0x8] ss:$0 sm:$0xff] }
 0x5ed   : > { %1484 = vmatprep.subr.bf16.mxu1 %v1630_v32 }
 0x5f0   : > { %1485 = vmatpush3.bf16.msra.mxu1 %v1559_v3 }
 0x5f1   : > { %1486 = vmatprep.subr.bf16.mxu1 %v1630_v32 }
 0x5f4   : > { %1487 = vmatpush3.bf16.msra.mxu1 %v1560_v4 }
 0x5f5   : > { %1488 = vmatprep.subr.bf16.mxu1 %v1630_v32 }
 0x5f8   : > { %1489 = vmatpush3.bf16.msra.mxu1 %v1561_v5 }
 0x6ab   : > { %v947_v22 = vpop.f32.mrf.mxu1 }
 0x6ac   : > { %v948_v23 = vadd.f32 %v947_v22, %v897_v21 }
 0x6ad   : > { %v1472_v24 = vpop.f32.mrf.mxu1 }
 0x6ae   : > { %v954_v25 = vadd.f32 %v948_v23, %v1791_v34 }
 0x6af   : > { %v950_v26 = vpop.f32.mrf.mxu1 }
 0x6b0   : > { %v951_v27 = vadd.f32 %v950_v26, %v897_v21  ;;  %v956_v28 = vsel %vm561_vm2, %v954_v25, 0.0 }
 0x6b1   : > { %957 = vadd.xlane.f32.xlu1 %v956_v28  ;;  %v1473_v29 = vpop.f32.mrf.mxu1 }
 0x6b2   : > { %v955_v30 = vadd.f32 %v951_v27, %v1794_v35  ;;  %v1557_v35 = vld [vmem:[%s1751_s18] sm:$0xff]  }
 0x6b3   : > { %1477 = vmatpush3.bf16.msra.mxu0 %v1557_v35 }
 0x6b4   : > { %v959_v31 = vsel %vm561_vm2, %v955_v30, 0.0 }
 0x6b5   : > { %960 = vadd.xlane.f32.xlu0 %v959_v31  ;;  %v1092_v31 = vsub.s32 6, %v1799_v37 }
 0x73a   : > { %v958_v33 = vpop.xlane.xlu1 %957 }
 0x73b   : > { %v963_v38 = vmul.f32 0.03125, %v958_v33  ;;  %v1093_v33 = vrot.slane %v1797_v36, %v1092_v31 }
 0x73d   : > { %v965_v39 = vsub.f32 %v954_v25, %v963_v38 }
 0x73e   : > { %v961_v40 = vpop.xlane.xlu0 %960 }
 0x73f   : > { %v964_v42 = vmul.f32 0.03125, %v961_v40  ;;  %v967_v43 = vmul.f32 %v965_v39, %v965_v39 }
 0x741   : > { %v966_v34 = vsub.f32 %v955_v30, %v964_v42  ;;  %v969_v44 = vsel %vm561_vm2, %v967_v43, 0.0 }
 0x742   : > { %970 = vadd.xlane.f32.xlu1 %v969_v44 }
 0x743   : > { %v968_v46 = vmul.f32 %v966_v34, %v966_v34 }
 0x745   : > { %v972_v47 = vsel %vm561_vm2, %v968_v46, 0.0 }
 0x746   : > { %973 = vadd.xlane.f32.xlu1 %v972_v47 }
 0x7cb   : > { %v971_v41 = vpop.xlane.xlu1 %970 }
 0x7cc   : > { %v975_v45 = vmul.f32 0.03125, %v971_v41 }
 0x7ce   : > { %v977_v49 = vadd.f32 1e-12, %v975_v45 }
 0x7cf   : > { %v974_v50 = vpop.xlane.xlu1 %973 }
 0x7d0   : > { %1578 = vrsqrt.f32 %v977_v49  ;;  %v976_v51 = vmul.f32 0.03125, %v974_v50 }
 0x7d2   : > { %v978_v52 = vadd.f32 1e-12, %v976_v51 }
 0x7d4   : > { %1580 = vrsqrt.f32 %v978_v52 }
 0x7dd   : > { %v1579_v54 = vpop.eup %1578 }
 0x7de   : > { %v981_v55 = vmul.f32 %v1579_v54, %v965_v39 }
 0x7e0   : > { %v987_v60 = vmul.f32 %v986_v56, %v981_v55 }
 0x7e1   : > { %v1581_v58 = vpop.eup %1580 }
 0x7e2   : > { %v982_v59 = vmul.f32 %v1581_v58, %v966_v34  ;;  %v993_v63 = vadd.f32 %v992_v61, %v987_v60 }
 0x7e4   : > { %v988_v62 = vmul.f32 %v986_v56, %v982_v59 }
 0x7e6   : > { %v994_v0 = vadd.f32 %v992_v61, %v988_v62  ;;  %v1193_v62 = vsub.s32 7, %v1799_v37 }
 0x7e8   : > { %v995_v1 = vpack.c.bf16 %v994_v0, %v993_v63 }
 0x7ea   : > { %1479 = vmatmul.mubr.msk.bf16.vlgmr.msra.gmra.mxu0 %vm561_vm2, %v995_v1 }
 0x8aa   : > { %v1056_v7 = vpop.f32.mrf.mxu0 }
 0x8ab   : > { %v1057_v8 = vadd.f32 %v1388_v6, %v1056_v7 }
 0x8ac   : > { %v1480_v9 = vpop.f32.mrf.mxu0 }
 0x8ad   : > { %v1065_v10 = vmul.f32 0.044715, %v1057_v8  ;;  %v1063_v25 = vmul.f32 0.5, %v1057_v8 }
 0x8ae   : > { %v1059_v11 = vpop.f32.mrf.mxu0 }
 0x8af   : > { %v1067_v12 = vmul.f32 %v1065_v10, %v1057_v8  ;;  %v1060_v13 = vadd.f32 %v1388_v6, %v1059_v11 }
 0x8b0   : > { %v1481_v14 = vpop.f32.mrf.mxu0 }
 0x8b1   : > { %v1069_v15 = vmul.f32 %v1067_v12, %v1057_v8  ;;  %v1066_v16 = vmul.f32 0.044715, %v1060_v13  ;;  %v1064_v26 = vmul.f32 0.5, %v1060_v13 }
 0x8b3   : > { %v1071_v17 = vadd.f32 %v1069_v15, %v1057_v8  ;;  %v1068_v18 = vmul.f32 %v1066_v16, %v1060_v13 }
 0x8b5   : > { %v1073_v19 = vmul.f32 0.7978846, %v1071_v17  ;;  %v1070_v32 = vmul.f32 %v1068_v18, %v1060_v13 }
 0x8b7   : > { %1582 = vtanh.f32 %v1073_v19  ;;  %v1072_v20 = vadd.f32 %v1070_v32, %v1060_v13 }
 0x8b9   : > { %v1074_v21 = vmul.f32 0.7978846, %v1072_v20 }
 0x8bb   : > { %1584 = vtanh.f32 %v1074_v21 }
 0x8c4   : > { %v1583_v22 = vpop.eup %1582 }
 0x8c5   : > { %v1077_v23 = vadd.f32 1.0, %v1583_v22 }
 0x8c7   : > { %v1079_v28 = vmul.f32 %v1077_v23, %v1063_v25 }
 0x8c8   : > { %v1585_v24 = vpop.eup %1584 }
 0x8c9   : > { %v1078_v27 = vadd.f32 1.0, %v1585_v24 }
 0x8cb   : > { %v1080_v29 = vmul.f32 %v1078_v27, %v1064_v26 }
 0x8cd   : > { %v1081_v30 = vpack.c.bf16 %v1080_v29, %v1079_v28 }
 0x8cf   : > { %1491 = vmatmul.mubr.msk.bf16.vlgmr.msra.gmra.mxu1 %vm1118_vm4, %v1081_v30 }
 0x98f   : > { %v1156_v38 = vpop.f32.mrf.mxu1 }
 0x990   : > { %v1157_v39 = vadd.f32 %v1156_v38, %v1093_v33 }
 0x991   : > { %v1492_v40 = vpop.f32.mrf.mxu1 }
 0x992   : > { %v1163_v42 = vadd.f32 %v1157_v39, %v993_v63  ;;  %v1194_v63 = vrot.slane %v1797_v36, %v1193_v62 }
 0x993   : > { %v1159_v43 = vpop.f32.mrf.mxu1 }
 0x994   : > { %v1160_v34 = vadd.f32 %v1159_v43, %v1093_v33  ;;  %v1165_v44 = vsel %vm561_vm2, %v1163_v42, 0.0 }
 0x995   : > { %1166 = vadd.xlane.f32.xlu1 %v1165_v44  ;;  %v1493_v46 = vpop.f32.mrf.mxu1 }
 0x996   : > { %v1164_v47 = vadd.f32 %v1160_v34, %v994_v0 }
 0x998   : > { %v1168_v48 = vsel %vm561_vm2, %v1164_v47, 0.0 }
 0x999   : > { %1169 = vadd.xlane.f32.xlu0 %v1168_v48 }
 0xa1e   : > { %v1167_v35 = vpop.xlane.xlu1 %1166 }
 0xa1f   : > { %v1171_v41 = vmul.f32 0.03125, %v1167_v35 }
 0xa21   : > { %v1173_v45 = vsub.f32 %v1163_v42, %v1171_v41 }
 0xa22   : > { %v1170_v49 = vpop.xlane.xlu0 %1169 }
 0xa23   : > { %v1172_v50 = vmul.f32 0.03125, %v1170_v49  ;;  %v1175_v51 = vmul.f32 %v1173_v45, %v1173_v45 }
 0xa25   : > { %v1174_v52 = vsub.f32 %v1164_v47, %v1172_v50  ;;  %v1177_v53 = vsel %vm561_vm2, %v1175_v51, 0.0 }
 0xa26   : > { %1178 = vadd.xlane.f32.xlu1 %v1177_v53 }
 0xa27   : > { %v1176_v54 = vmul.f32 %v1174_v52, %v1174_v52 }
 0xa29   : > { %v1180_v55 = vsel %vm561_vm2, %v1176_v54, 0.0 }
 0xa2a   : > { %1181 = vadd.xlane.f32.xlu0 %v1180_v55 }
 0xaaf   : > { %v1179_v56 = vpop.xlane.xlu1 %1178 }
 0xab0   : > { %v1183_v57 = vmul.f32 0.03125, %v1179_v56 }
 0xab2   : > { %v1185_v58 = vadd.f32 1e-12, %v1183_v57 }
 0xab3   : > { %v1182_v59 = vpop.xlane.xlu0 %1181 }
 0xab4   : > { %1586 = vrsqrt.f32 %v1185_v58  ;;  %v1184_v60 = vmul.f32 0.03125, %v1182_v59 }
 0xab6   : > { %v1186_v61 = vadd.f32 1e-12, %v1184_v60 }
 0xab8   : > { %1588 = vrsqrt.f32 %v1186_v61 }
 0xac1   : > { %v1587_v0 = vpop.eup %1586 }
 0xac2   : > { %v1189_v1 = vmul.f32 %v1587_v0, %v1173_v45 }
 0xac4   : > { %v1195_v3 = vmul.f32 %v1194_v63, %v1189_v1 }
 0xac5   : > { %v1589_v4 = vpop.eup %1588 }
 0xac6   : > { %v1201_v5 = vadd.f32 %v1397_v2, %v1195_v3  ;;  %v1190_v6 = vmul.f32 %v1589_v4, %v1174_v52 }
 0xac8   : > { %1203 = vst.msk [vmem:[%s1767_s10] sm:$0xff] %vm561_vm2, %v1201_v5  ;;  %v1196_v7 = vmul.f32 %v1194_v63, %v1190_v6 }
 0xaca   : > { %v1202_v8 = vadd.f32 %v1397_v2, %v1196_v7 }
 0xacc   : > { %1204 = vst.msk [vmem:[%s1767_s10 + $0x8] sm:$0xff] %vm561_vm2, %v1202_v8 }
 0xacd PF: > { %s19_s13 = sadd.s32 1, %s1628_s13   ;;  %s1937_s10 = sld [smem:[#allocation2_spill]] }
 0xace   : > { %p16_p8 = scmp.ge.s32.totalorder %s19_s13, 6   ;;  %s1938_s16 = sld [smem:[#allocation3_spill]] }
 0xacf   : > { %s1939_s12 = sld [smem:[#allocation4_spill]]  ;;  %s1940_s30 = smov %s1620_s11 }
 0xad0   :  { %18 = sbr.rel (!%p16_p8) target bundleno = 4 (0x4), region = 111 }
 0xad4   : > { %s1941_s11 = smov %s1938_s16 }

</bundles_post_ra>
